<compile_context>
chip_gen: v6e
topology: v6e:2x2x1
jax: 0.10.0
libtpu: 0.0.40
codegen_flags: <defaults>
</compile_context>

<pallas_src>
import functools

import jax
import jax.numpy as jnp
from jax.experimental import pallas as pl
from jax.experimental.pallas import tpu as pltpu

LANE = 128


def _round_up(v, m):
    return (v + m - 1) // m * m


# ----------------------------------------------------------------------------
# Pallas kernel: the entire ChebNet forward (all layers fused)
# ----------------------------------------------------------------------------
def _chebnet_fused_kernel(l_ref, x_ref, *rest, K, num_hidden):
    # rest = (w_pre_ref, *w_hidden_refs, w_out_ref, o_ref)
    w_refs = rest[:-1]
    o_ref = rest[-1]

    def cheb_layer(h, w_ref, add_residual, apply_relu):
        # h: [Np, C_pad] f32 (recurrence state / residual base kept in f32)
        # w_ref: [K, C_pad, Cout_pad] bf16 VMEM ref
        # L@T and T@W are K accumulating bf16 MXU dots with f32 accumulation;
        # no concat slab, only two T panels live at a time.
        h_lo = h.astype(jnp.bfloat16)
        out = jnp.dot(h_lo, w_ref[0], preferred_element_type=jnp.float32)
        if K >= 2:
            t_prev = h
            # read l_ref at each use site instead of pinning an N^2 value
            t_curr = jnp.dot(l_ref[...], h_lo, preferred_element_type=jnp.float32)
            out = out + jnp.dot(t_curr.astype(jnp.bfloat16), w_ref[1],
                                preferred_element_type=jnp.float32)
            for j in range(2, K):
                # Chebyshev recurrence T_k = 2 L T_{k-1} - T_{k-2} (f32 state)
                t_next = (2.0 * jnp.dot(l_ref[...], t_curr.astype(jnp.bfloat16),
                                        preferred_element_type=jnp.float32)
                          - t_prev)
                out = out + jnp.dot(t_next.astype(jnp.bfloat16), w_ref[j],
                                    preferred_element_type=jnp.float32)
                t_prev, t_curr = t_curr, t_next
        if add_residual:
            out = out + h          # padded channels are zero on both sides
        if apply_relu:
            out = jnp.maximum(out, 0.0)
        return out

    h = x_ref[...].astype(jnp.float32)
    # pre layer + ReLU
    h = cheb_layer(h, w_refs[0], add_residual=False, apply_relu=True)
    # hidden layers: h = relu(h + conv(h))
    for i in range(num_hidden):
        h = cheb_layer(h, w_refs[1 + i], add_residual=True, apply_relu=True)
    # output layer (no activation, no residual)
    h = cheb_layer(h, w_refs[1 + num_hidden], add_residual=False, apply_relu=False)

    o_ref[...] = h.astype(o_ref.dtype)


# ----------------------------------------------------------------------------
# Dense scaled Laplacian L_hat = 2 * L_sym / lambda_max - I
# (matches torch_geometric.utils.get_laplacian(normalization='sym');
#  self-loops removed, lambda_max defaults to 2.0, same as get_Laplacian_matrix.
#  NOTE: duplicate edges are scatter-added, matching PyG's scatter semantics.)
# ----------------------------------------------------------------------------
def build_L_hat(edge_index, N, lambda_max=2.0):
    row, col = edge_index[0], edge_index[1]
    w = jnp.where(row != col, 1.0, 0.0)                 # remove self loops
    A = jnp.zeros((N, N), jnp.float32).at[row, col].add(w)
    deg = A.sum(axis=1)
    dinv_sqrt = jnp.where(deg > 0, 1.0 / jnp.sqrt(deg), 0.0)
    L_sym = jnp.eye(N, dtype=jnp.float32) - dinv_sqrt[:, None] * A * dinv_sqrt[None, :]
    return 2.0 * L_sym / lambda_max - jnp.eye(N, dtype=jnp.float32)


def _pad_weight(W, cin_pad, cout_pad):
    """[K, Cin, Cout] -> zero-padded [K, cin_pad, cout_pad], bf16 (MXU operand)."""
    K, ci, co = W.shape
    Wp = jnp.zeros((K, cin_pad, cout_pad), jnp.float32).at[:, :ci, :co].set(W)
    return Wp.astype(jnp.bfloat16)


def _vmem_capacity_bytes():
    """Per-generation physical VMEM per TensorCore (v5e/v6e 128 MiB, v7x 64 MiB)."""
    try:
        cap = getattr(pltpu.get_tpu_info(), "vmem_capacity_bytes", None)
        if cap:
            return int(cap)
    except Exception:
        pass
    return 64 * 1024 * 1024  # conservative v7x floor


def _estimate_vmem_bytes(N_pad, Cin_pad, Hid_pad, Out_pad, K, num_hidden):
    max_c = max(Cin_pad, Hid_pad, Out_pad)
    in_b = N_pad * N_pad * 2 + N_pad * Cin_pad * 4                        # bf16 L + f32 x
    w_b = K * 2 * (Cin_pad * Hid_pad + num_hidden * Hid_pad * Hid_pad
                   + Hid_pad * Out_pad)                                   # bf16 weights
    out_b = N_pad * Out_pad * 4
    tmp_b = 6 * N_pad * max_c * 4                                         # live f32 panels
    return in_b + w_b + out_b + tmp_b


# ----------------------------------------------------------------------------
# jitted fused pallas_call on pre-baked padded operands
# ----------------------------------------------------------------------------
@functools.partial(jax.jit, static_argnames=("vmem_limit",))
def _chebnet_fused_call(L_pad, x_pad, weights, *, vmem_limit):
    K = weights[0].shape[0]
    num_hidden = len(weights) - 2
    N_pad = L_pad.shape[0]
    Out_pad = weights[-1].shape[2]

    kernel = functools.partial(_chebnet_fused_kernel, K=K, num_hidden=num_hidden)
    vmem_spec = pl.BlockSpec(memory_space=pltpu.MemorySpace.VMEM)

    return pl.pallas_call(
        kernel,
        out_shape=jax.ShapeDtypeStruct((N_pad, Out_pad), jnp.float32),
        in_specs=[vmem_spec] * (2 + len(weights)),
        out_specs=vmem_spec,
        compiler_params=pltpu.CompilerParams(vmem_limit_bytes=vmem_limit),
    )(L_pad, x_pad, *weights)


# ----------------------------------------------------------------------------
# One-time precompute: Laplacian, padding, weight stacking (hoisted off the
# per-forward path) + per-generation VMEM gating.
# ----------------------------------------------------------------------------
def prepare_chebnet(params, edge_index, num_nodes, lambda_max=2.0):
    K, Cin, Hid = params["pre"].shape
    Cout = params["out"].shape[2]
    num_hidden = len(params["hiddens"])

    # Residual path of hidden layers requires Cin == Cout there.
    for W_h in params["hiddens"]:
        assert W_h.shape[1] == Hid and W_h.shape[2] == Hid, (
            "hidden chebConv must be square (residual add requires Cin == Cout)"
        )
    assert params["out"].shape[1] == Hid and params["pre"].shape[2] == Hid

    # Pad nodes AND channels to the lane unit (128): lane-dense L, lane-dense
    # feature/output tiles, and MXU-friendly contraction dims.  Zero padding
    # is exact: padded L rows/cols and weight rows/cols are zero, so padded
    # nodes/channels stay zero through recurrence, residual add and ReLU.
    N_pad = _round_up(max(num_nodes, 1), LANE)
    Cin_pad = _round_up(Cin, LANE)
    Hid_pad = _round_up(Hid, LANE)
    Out_pad = _round_up(Cout, LANE)

    L_hat = build_L_hat(edge_index, num_nodes, lambda_max)
    L_pad = (jnp.zeros((N_pad, N_pad), jnp.float32)
             .at[:num_nodes, :num_nodes].set(L_hat)
             .astype(jnp.bfloat16))                      # bf16 halves VMEM/HBM for L

    weights = tuple(
        [_pad_weight(params["pre"], Cin_pad, Hid_pad)]
        + [_pad_weight(W_h, Hid_pad, Hid_pad) for W_h in params["hiddens"]]
        + [_pad_weight(params["out"], Hid_pad, Out_pad)]
    )

    need = _estimate_vmem_bytes(N_pad, Cin_pad, Hid_pad, Out_pad, K, num_hidden)
    budget = int(_vmem_capacity_bytes() * 0.85)          # ~15% headroom per generation
    if need > budget:
        # TODO(synk): tiled streaming path (row-parallel L tiles) for large N.
        raise NotImplementedError(
            f"fused whole-L-resident ChebNet needs ~{need} B VMEM > budget {budget} B; "
            "tiled streaming variant not implemented")
    vmem_limit = int(min(budget, max(16 * 1024 * 1024, 2 * need)))

    baked = {"L": L_pad, "weights": weights}
    meta = {"N": num_nodes, "Cin": Cin, "Cout": Cout,
            "N_pad": N_pad, "Cin_pad": Cin_pad, "vmem_limit": vmem_limit}
    return baked, meta


def chebnet_forward_baked(baked, meta, x):
    x_pad = (jnp.zeros((meta["N_pad"], meta["Cin_pad"]), jnp.float32)
             .at[:meta["N"], :meta["Cin"]].set(x))
    out_pad = _chebnet_fused_call(baked["L"], x_pad, baked["weights"],
                                  vmem_limit=meta["vmem_limit"])
    return out_pad[:meta["N"], :meta["Cout"]]


def chebnet_forward(params, x, edge_index):
    """Convenience one-shot wrapper matching ChebNet.forward(x, edge_index)."""
    baked, meta = prepare_chebnet(params, edge_index, x.shape[0])
    return chebnet_forward_baked(baked, meta, x)


# ----------------------------------------------------------------------------
# Pure-JAX f32 reference (mirrors the PyTorch module) for correctness checking
# ----------------------------------------------------------------------------
def _cheb_conv_ref(x, L, Wt):
    K = Wt.shape[0]
    T0, T1 = x, L @ x
    out = T0 @ Wt[0]
    for j in range(1, K):
        if j == 1:
            out = out + T1 @ Wt[1]
        else:
            T2 = 2.0 * (L @ T1) - T0
            out = out + T2 @ Wt[j]
            T0, T1 = T1, T2
    return out


def chebnet_forward_ref(params, x, edge_index):
    N = x.shape[0]
    L = build_L_hat(edge_index, N)
    x = jax.nn.relu(_cheb_conv_ref(x, L, params["pre"]))
    for W_h in params["hiddens"]:
        x = jax.nn.relu(x + _cheb_conv_ref(x, L, W_h))
    return _cheb_conv_ref(x, L, params["out"])


# ----------------------------------------------------------------------------
# Deterministic parameter init (nn.Linear(in, out, bias=False) per order k;
# stored pre-transposed as [K, in, out])
# ----------------------------------------------------------------------------
def init_cheb_weights(key, K, c_in, c_out):
    bound = 1.0 / jnp.sqrt(c_in)
    return jax.random.uniform(
        key, (K, c_in, c_out), dtype=jnp.float32, minval=-bound, maxval=bound
    )


if __name__ == "__main__":
    # Small deterministic problem.
    N = 16            # number of graph nodes
    IN_C = 4          # in_channels
    HID_C = 32        # hidden_channels
    OUT_C = 8         # out_channels
    K = 3             # Chebyshev filter order
    LAYERS = 3        # -> one hidden chebConv block (residual + ReLU path)

    key = jax.random.PRNGKey(0)
    k_x, k_pre, k_hid, k_out, k_edges = jax.random.split(key, 5)

    # Node features [N, IN_C]
    x = jax.random.normal(k_x, (N, IN_C), dtype=jnp.float32)

    # Deterministic edge_index: symmetric ring + a few extra random edges.
    src = jnp.arange(N)
    dst = (src + 1) % N
    extra_src = jax.random.randint(k_edges, (8,), 0, N)
    extra_dst = jax.random.randint(jax.random.fold_in(k_edges, 1), (8,), 0, N)
    rows = jnp.concatenate([src, dst, extra_src, extra_dst])
    cols = jnp.concatenate([dst, src, extra_dst, extra_src])
    edge_index = jnp.stack([rows, cols]).astype(jnp.int32)   # [2, 48]

    # Parameters: pre (IN->HID), (LAYERS-2) hiddens (HID->HID), out (HID->OUT)
    params = {
        "pre": init_cheb_weights(k_pre, K, IN_C, HID_C),
        "hiddens": [
            init_cheb_weights(jax.random.fold_in(k_hid, i), K, HID_C, HID_C)
            for i in range(LAYERS - 2)
        ],
        "out": init_cheb_weights(k_out, K, HID_C, OUT_C),
    }

    # Precompute once (Laplacian + padding + weight baking), then run the kernel.
    baked, meta = prepare_chebnet(params, edge_index, N)
    out = chebnet_forward_baked(baked, meta, x)
    out = jax.block_until_ready(out)

    ref = chebnet_forward_ref(params, x, edge_index)
    ref = jax.block_until_ready(ref)

    assert out.shape == (N, OUT_C), out.shape
    # bf16 MXU operands (f32 accumulation / f32 recurrence state) give ~0.4%
    # per-operand rounding, compounded over 3 stacked cheb layers -> ~1-2%
    # relative error vs the pure-f32 reference.
    max_diff = float(jnp.max(jnp.abs(out - ref)))
    assert jnp.allclose(out, ref, atol=3e-2, rtol=3e-2), max_diff

    print("KERNEL_OK")
</pallas_src>

<mosaic_0001>
module attributes {stable_mosaic.version = 11 : i64} {
  func.func @_chebnet_fused_kernel(%arg0: memref<128x128xbf16, #tpu.memory_space<vmem>>, %arg1: memref<128x128xf32, #tpu.memory_space<vmem>>, %arg2: memref<3x128x128xbf16, #tpu.memory_space<vmem>>, %arg3: memref<3x128x128xbf16, #tpu.memory_space<vmem>>, %arg4: memref<3x128x128xbf16, #tpu.memory_space<vmem>>, %arg5: memref<128x128xf32, #tpu.memory_space<vmem>>) attributes {dimension_semantics = [], scalar_prefetch = 0 : i64, scratch_operands = 0 : i64, tpu.core_type = #tpu.core_type<tc>} {
    %c0 = arith.constant 0 : index
    %c0_0 = arith.constant 0 : index
    %0 = vector.load %arg1[%c0, %c0_0] : memref<128x128xf32, #tpu.memory_space<vmem>>, vector<128x128xf32>
    %1 = arith.truncf %0 : vector<128x128xf32> to vector<128x128xbf16>
    %c0_1 = arith.constant 0 : index
    %c0_2 = arith.constant 0 : index
    %c0_3 = arith.constant 0 : index
    %2 = vector.load %arg2[%c0_1, %c0_2, %c0_3] : memref<3x128x128xbf16, #tpu.memory_space<vmem>>, vector<1x128x128xbf16>
    %3 = vector.shape_cast %2 : vector<1x128x128xbf16> to vector<128x128xbf16>
    %cst = arith.constant dense<0.000000e+00> : vector<128x128xf32>
    %4 = tpu.matmul %1, %3, %cst {dimension_numbers = #tpu.dot_dimension_numbers<[1], [0], [0], [1], [0, 0, 1, 1], [], []>} : vector<128x128xbf16>, vector<128x128xbf16>, vector<128x128xf32> -> vector<128x128xf32>
    %c0_4 = arith.constant 0 : index
    %c0_5 = arith.constant 0 : index
    %5 = vector.load %arg0[%c0_4, %c0_5] : memref<128x128xbf16, #tpu.memory_space<vmem>>, vector<128x128xbf16>
    %cst_6 = arith.constant dense<0.000000e+00> : vector<128x128xf32>
    %6 = tpu.matmul %5, %1, %cst_6 {dimension_numbers = #tpu.dot_dimension_numbers<[1], [0], [0], [1], [0, 0, 1, 1], [], []>} : vector<128x128xbf16>, vector<128x128xbf16>, vector<128x128xf32> -> vector<128x128xf32>
    %7 = arith.truncf %6 : vector<128x128xf32> to vector<128x128xbf16>
    %c1 = arith.constant 1 : index
    %c0_7 = arith.constant 0 : index
    %c0_8 = arith.constant 0 : index
    %8 = vector.load %arg2[%c1, %c0_7, %c0_8] : memref<3x128x128xbf16, #tpu.memory_space<vmem>>, vector<1x128x128xbf16>
    %9 = vector.shape_cast %8 : vector<1x128x128xbf16> to vector<128x128xbf16>
    %cst_9 = arith.constant dense<0.000000e+00> : vector<128x128xf32>
    %10 = tpu.matmul %7, %9, %cst_9 {dimension_numbers = #tpu.dot_dimension_numbers<[1], [0], [0], [1], [0, 0, 1, 1], [], []>} : vector<128x128xbf16>, vector<128x128xbf16>, vector<128x128xf32> -> vector<128x128xf32>
    %11 = arith.addf %4, %10 : vector<128x128xf32>
    %c0_10 = arith.constant 0 : index
    %c0_11 = arith.constant 0 : index
    %12 = vector.load %arg0[%c0_10, %c0_11] : memref<128x128xbf16, #tpu.memory_space<vmem>>, vector<128x128xbf16>
    %13 = arith.truncf %6 : vector<128x128xf32> to vector<128x128xbf16>
    %cst_12 = arith.constant dense<0.000000e+00> : vector<128x128xf32>
    %14 = tpu.matmul %12, %13, %cst_12 {dimension_numbers = #tpu.dot_dimension_numbers<[1], [0], [0], [1], [0, 0, 1, 1], [], []>} : vector<128x128xbf16>, vector<128x128xbf16>, vector<128x128xf32> -> vector<128x128xf32>
    %cst_13 = arith.constant 2.000000e+00 : f32
    %15 = vector.broadcast %cst_13 : f32 to vector<128x128xf32>
    %16 = arith.mulf %15, %14 : vector<128x128xf32>
    %17 = arith.subf %16, %0 : vector<128x128xf32>
    %18 = arith.truncf %17 : vector<128x128xf32> to vector<128x128xbf16>
    %c2 = arith.constant 2 : index
    %c0_14 = arith.constant 0 : index
    %c0_15 = arith.constant 0 : index
    %19 = vector.load %arg2[%c2, %c0_14, %c0_15] : memref<3x128x128xbf16, #tpu.memory_space<vmem>>, vector<1x128x128xbf16>
    %20 = vector.shape_cast %19 : vector<1x128x128xbf16> to vector<128x128xbf16>
    %cst_16 = arith.constant dense<0.000000e+00> : vector<128x128xf32>
    %21 = tpu.matmul %18, %20, %cst_16 {dimension_numbers = #tpu.dot_dimension_numbers<[1], [0], [0], [1], [0, 0, 1, 1], [], []>} : vector<128x128xbf16>, vector<128x128xbf16>, vector<128x128xf32> -> vector<128x128xf32>
    %22 = arith.addf %11, %21 : vector<128x128xf32>
    %cst_17 = arith.constant 0.000000e+00 : f32
    %23 = vector.broadcast %cst_17 : f32 to vector<128x128xf32>
    %24 = arith.maximumf %22, %23 : vector<128x128xf32>
    %25 = arith.truncf %24 : vector<128x128xf32> to vector<128x128xbf16>
    %c0_18 = arith.constant 0 : index
    %c0_19 = arith.constant 0 : index
    %c0_20 = arith.constant 0 : index
    %26 = vector.load %arg3[%c0_18, %c0_19, %c0_20] : memref<3x128x128xbf16, #tpu.memory_space<vmem>>, vector<1x128x128xbf16>
    %27 = vector.shape_cast %26 : vector<1x128x128xbf16> to vector<128x128xbf16>
    %cst_21 = arith.constant dense<0.000000e+00> : vector<128x128xf32>
    %28 = tpu.matmul %25, %27, %cst_21 {dimension_numbers = #tpu.dot_dimension_numbers<[1], [0], [0], [1], [0, 0, 1, 1], [], []>} : vector<128x128xbf16>, vector<128x128xbf16>, vector<128x128xf32> -> vector<128x128xf32>
    %c0_22 = arith.constant 0 : index
    %c0_23 = arith.constant 0 : index
    %29 = vector.load %arg0[%c0_22, %c0_23] : memref<128x128xbf16, #tpu.memory_space<vmem>>, vector<128x128xbf16>
    %cst_24 = arith.constant dense<0.000000e+00> : vector<128x128xf32>
    %30 = tpu.matmul %29, %25, %cst_24 {dimension_numbers = #tpu.dot_dimension_numbers<[1], [0], [0], [1], [0, 0, 1, 1], [], []>} : vector<128x128xbf16>, vector<128x128xbf16>, vector<128x128xf32> -> vector<128x128xf32>
    %31 = arith.truncf %30 : vector<128x128xf32> to vector<128x128xbf16>
    %c1_25 = arith.constant 1 : index
    %c0_26 = arith.constant 0 : index
    %c0_27 = arith.constant 0 : index
    %32 = vector.load %arg3[%c1_25, %c0_26, %c0_27] : memref<3x128x128xbf16, #tpu.memory_space<vmem>>, vector<1x128x128xbf16>
    %33 = vector.shape_cast %32 : vector<1x128x128xbf16> to vector<128x128xbf16>
    %cst_28 = arith.constant dense<0.000000e+00> : vector<128x128xf32>
    %34 = tpu.matmul %31, %33, %cst_28 {dimension_numbers = #tpu.dot_dimension_numbers<[1], [0], [0], [1], [0, 0, 1, 1], [], []>} : vector<128x128xbf16>, vector<128x128xbf16>, vector<128x128xf32> -> vector<128x128xf32>
    %35 = arith.addf %28, %34 : vector<128x128xf32>
    %c0_29 = arith.constant 0 : index
    %c0_30 = arith.constant 0 : index
    %36 = vector.load %arg0[%c0_29, %c0_30] : memref<128x128xbf16, #tpu.memory_space<vmem>>, vector<128x128xbf16>
    %37 = arith.truncf %30 : vector<128x128xf32> to vector<128x128xbf16>
    %cst_31 = arith.constant dense<0.000000e+00> : vector<128x128xf32>
    %38 = tpu.matmul %36, %37, %cst_31 {dimension_numbers = #tpu.dot_dimension_numbers<[1], [0], [0], [1], [0, 0, 1, 1], [], []>} : vector<128x128xbf16>, vector<128x128xbf16>, vector<128x128xf32> -> vector<128x128xf32>
    %cst_32 = arith.constant 2.000000e+00 : f32
    %39 = vector.broadcast %cst_32 : f32 to vector<128x128xf32>
    %40 = arith.mulf %39, %38 : vector<128x128xf32>
    %41 = arith.subf %40, %24 : vector<128x128xf32>
    %42 = arith.truncf %41 : vector<128x128xf32> to vector<128x128xbf16>
    %c2_33 = arith.constant 2 : index
    %c0_34 = arith.constant 0 : index
    %c0_35 = arith.constant 0 : index
    %43 = vector.load %arg3[%c2_33, %c0_34, %c0_35] : memref<3x128x128xbf16, #tpu.memory_space<vmem>>, vector<1x128x128xbf16>
    %44 = vector.shape_cast %43 : vector<1x128x128xbf16> to vector<128x128xbf16>
    %cst_36 = arith.constant dense<0.000000e+00> : vector<128x128xf32>
    %45 = tpu.matmul %42, %44, %cst_36 {dimension_numbers = #tpu.dot_dimension_numbers<[1], [0], [0], [1], [0, 0, 1, 1], [], []>} : vector<128x128xbf16>, vector<128x128xbf16>, vector<128x128xf32> -> vector<128x128xf32>
    %46 = arith.addf %35, %45 : vector<128x128xf32>
    %47 = arith.addf %46, %24 : vector<128x128xf32>
    %cst_37 = arith.constant 0.000000e+00 : f32
    %48 = vector.broadcast %cst_37 : f32 to vector<128x128xf32>
    %49 = arith.maximumf %47, %48 : vector<128x128xf32>
    %50 = arith.truncf %49 : vector<128x128xf32> to vector<128x128xbf16>
    %c0_38 = arith.constant 0 : index
    %c0_39 = arith.constant 0 : index
    %c0_40 = arith.constant 0 : index
    %51 = vector.load %arg4[%c0_38, %c0_39, %c0_40] : memref<3x128x128xbf16, #tpu.memory_space<vmem>>, vector<1x128x128xbf16>
    %52 = vector.shape_cast %51 : vector<1x128x128xbf16> to vector<128x128xbf16>
    %cst_41 = arith.constant dense<0.000000e+00> : vector<128x128xf32>
    %53 = tpu.matmul %50, %52, %cst_41 {dimension_numbers = #tpu.dot_dimension_numbers<[1], [0], [0], [1], [0, 0, 1, 1], [], []>} : vector<128x128xbf16>, vector<128x128xbf16>, vector<128x128xf32> -> vector<128x128xf32>
    %c0_42 = arith.constant 0 : index
    %c0_43 = arith.constant 0 : index
    %54 = vector.load %arg0[%c0_42, %c0_43] : memref<128x128xbf16, #tpu.memory_space<vmem>>, vector<128x128xbf16>
    %cst_44 = arith.constant dense<0.000000e+00> : vector<128x128xf32>
    %55 = tpu.matmul %54, %50, %cst_44 {dimension_numbers = #tpu.dot_dimension_numbers<[1], [0], [0], [1], [0, 0, 1, 1], [], []>} : vector<128x128xbf16>, vector<128x128xbf16>, vector<128x128xf32> -> vector<128x128xf32>
    %56 = arith.truncf %55 : vector<128x128xf32> to vector<128x128xbf16>
    %c1_45 = arith.constant 1 : index
    %c0_46 = arith.constant 0 : index
    %c0_47 = arith.constant 0 : index
    %57 = vector.load %arg4[%c1_45, %c0_46, %c0_47] : memref<3x128x128xbf16, #tpu.memory_space<vmem>>, vector<1x128x128xbf16>
    %58 = vector.shape_cast %57 : vector<1x128x128xbf16> to vector<128x128xbf16>
    %cst_48 = arith.constant dense<0.000000e+00> : vector<128x128xf32>
    %59 = tpu.matmul %56, %58, %cst_48 {dimension_numbers = #tpu.dot_dimension_numbers<[1], [0], [0], [1], [0, 0, 1, 1], [], []>} : vector<128x128xbf16>, vector<128x128xbf16>, vector<128x128xf32> -> vector<128x128xf32>
    %60 = arith.addf %53, %59 : vector<128x128xf32>
    %c0_49 = arith.constant 0 : index
    %c0_50 = arith.constant 0 : index
    %61 = vector.load %arg0[%c0_49, %c0_50] : memref<128x128xbf16, #tpu.memory_space<vmem>>, vector<128x128xbf16>
    %62 = arith.truncf %55 : vector<128x128xf32> to vector<128x128xbf16>
    %cst_51 = arith.constant dense<0.000000e+00> : vector<128x128xf32>
    %63 = tpu.matmul %61, %62, %cst_51 {dimension_numbers = #tpu.dot_dimension_numbers<[1], [0], [0], [1], [0, 0, 1, 1], [], []>} : vector<128x128xbf16>, vector<128x128xbf16>, vector<128x128xf32> -> vector<128x128xf32>
    %cst_52 = arith.constant 2.000000e+00 : f32
    %64 = vector.broadcast %cst_52 : f32 to vector<128x128xf32>
    %65 = arith.mulf %64, %63 : vector<128x128xf32>
    %66 = arith.subf %65, %49 : vector<128x128xf32>
    %67 = arith.truncf %66 : vector<128x128xf32> to vector<128x128xbf16>
    %c2_53 = arith.constant 2 : index
    %c0_54 = arith.constant 0 : index
    %c0_55 = arith.constant 0 : index
    %68 = vector.load %arg4[%c2_53, %c0_54, %c0_55] : memref<3x128x128xbf16, #tpu.memory_space<vmem>>, vector<1x128x128xbf16>
    %69 = vector.shape_cast %68 : vector<1x128x128xbf16> to vector<128x128xbf16>
    %cst_56 = arith.constant dense<0.000000e+00> : vector<128x128xf32>
    %70 = tpu.matmul %67, %69, %cst_56 {dimension_numbers = #tpu.dot_dimension_numbers<[1], [0], [0], [1], [0, 0, 1, 1], [], []>} : vector<128x128xbf16>, vector<128x128xbf16>, vector<128x128xf32> -> vector<128x128xf32>
    %71 = arith.addf %60, %70 : vector<128x128xf32>
    %c0_57 = arith.constant 0 : index
    %c0_58 = arith.constant 0 : index
    %72 = vector.load %arg5[%c0_57, %c0_58] : memref<128x128xf32, #tpu.memory_space<vmem>>, vector<128x128xf32>
    tpu.vector_store %arg5[%c0_57, %c0_58], %71 {strides = array<i32>} : memref<128x128xf32, #tpu.memory_space<vmem>>, vector<128x128xf32>,
    return
  }
}

</mosaic_0001>

<bundles_post_ra>
// kernel: _chebnet_fused_call.1
= control target key start
LH: loop header
LB: loop body
LE: loop exit
PB: predicated region body
PF: predicated region fallthrough
CT: control target
= control target key end

     0   :  { %10 = vsyncpa [#allocation3], 0  ;;  %s4248_s0 = inlined_call_operand.hbm [shape: bf16[128,128], index: 0, kind: input, shape index: {}]   ;;  %s4249_s1 = inlined_call_operand.hbm [shape: f32[128,128], index: 1, kind: input, shape index: {}]   ;;  %s4250_s2 = inlined_call_operand.hbm [shape: bf16[3,128,128], index: 2, kind: input, shape index: {}]   ;;  %s4251_s3 = inlined_call_operand.hbm [shape: bf16[3,128,128], index: 3, kind: input, shape index: {}]   ;;  %s4252_s4 = inlined_call_operand.hbm [shape: bf16[3,128,128], index: 4, kind: input, shape index: {}]   ;;  %s4253_s5 = inlined_call_operand.hbm [shape: f32[128,128], index: 5, kind: output, shape index: {}]  }
   0x1   :  { %11 = vsyncpa [#allocation6], 0 }
   0x2   :  { %12 = vsyncpa [#allocation9], 0 }
   0x3   :  { %13 = vsyncpa [#allocation4], 0  ;;  %s3548_s18 = smov [#allocation5]  }
   0x4   :  { %s31_s19 = sshll.u32 %s3548_s18, 4  ;;  %s32_s19 = int_to_ptr.vmem [resolvable:$true] %s31_s19 }
   0x5   :  { %s3428_s20 = scalar_lea.vmem %s32_s19, 2048  ;;  %p3433_p1 = scmp.lt.s32.totalorder %s32_s19, %s32_s19 }
   0x6   :  { %p3429_p0 = scmp.ne.s32.totalorder %s32_s19, %s3428_s20  ;;  %p3434_p2 = scmp.lt.s32.totalorder %s3428_s20, %s3428_s20 }
   0x8   :  { %p3435_p3 = por %p3434_p2, %p3433_p1 }
   0xa   :  { %p3436_p4 = pnand %p3435_p3, %p3429_p0 }
   0xc   :  { %3439 = shalt.err (!%p3436_p4)
}
   0xd   :  { %s3549_s21 = smov 128   ;;  %s3550_s22 = smov 8  }
   0xe   :  { %37 = dma.hbm_to_vmem [thread:$0]  %s4249_s1, 2048, %s32_s19, [#allocation6], %s3549_s21, %s3549_s21, %s3550_s22  }
   0xf   :  { %s3551_s25 = smov [#allocation8]   ;;  %s3552_s27 = smov [#allocation2]  }
  0x10   :  { %s55_s26 = sshll.u32 %s3551_s25, 4  ;;  %s19_s28 = sshll.u32 %s3552_s27, 4  ;;  %s56_s26 = int_to_ptr.vmem [resolvable:$true] %s55_s26  ;;  %s20_s28 = int_to_ptr.vmem [resolvable:$true] %s19_s28 }
  0x11   :  { %s3448_s29 = scalar_lea.vmem %s56_s26, 3072  ;;  %p3453_p6 = scmp.lt.s32.totalorder %s56_s26, %s56_s26 }
  0x12   :  { %p3449_p5 = scmp.ne.s32.totalorder %s56_s26, %s3448_s29  ;;  %p3454_p7 = scmp.lt.s32.totalorder %s3448_s29, %s3448_s29 }
  0x14   :  { %p3455_p8 = por %p3454_p7, %p3453_p6 }
  0x16   :  { %p3456_p9 = pnand %p3455_p8, %p3449_p5 }
  0x18   :  { %3459 = shalt.err (!%p3456_p9)
}
  0x19   :  { %s3553_s30 = smov 64   ;;  %s3554_s6 = smov 4  }
  0x1a   :  { %61 = dma.hbm_to_vmem [thread:$0]  %s4251_s3, 3072, %s56_s26, [#allocation9], %s3553_s30, %s3553_s30, %s3554_s6  }
  0x1b   :  { %s3468_s1 = scalar_lea.vmem %s20_s28, 1024  ;;  %p3473_p11 = scmp.lt.s32.totalorder %s20_s28, %s20_s28 }
  0x1c   :  { %p3469_p10 = scmp.ne.s32.totalorder %s20_s28, %s3468_s1  ;;  %p3474_p12 = scmp.lt.s32.totalorder %s3468_s1, %s3468_s1 }
  0x1e   :  { %p3475_p13 = por %p3474_p12, %p3473_p11 }
  0x20   :  { %p3476_p0 = pnand %p3475_p13, %p3469_p10 }
  0x22   :  { %3479 = shalt.err (!%p3476_p0)
}
  0x23   :  { %25 = dma.hbm_to_vmem [thread:$0]  %s4248_s0, 1024, %s20_s28, [#allocation3], %s3553_s30, %s3553_s30, %s3554_s6  }
  0x24   :  { %s3555_s11 = smov [#allocation7]   ;;  %s3556_s13 = smov [#allocation10]  }
  0x25   :  { %s43_s12 = sshll.u32 %s3555_s11, 4  ;;  %s67_s3 = sshll.u32 %s3556_s13, 4  ;;  %s44_s12 = int_to_ptr.vmem [resolvable:$true] %s43_s12  ;;  %s68_s3 = int_to_ptr.vmem [resolvable:$true] %s67_s3 }
  0x26   :  { %s3488_s14 = scalar_lea.vmem %s44_s12, 3072  ;;  %p3493_p2 = scmp.lt.s32.totalorder %s44_s12, %s44_s12 }
  0x27   :  { %p3489_p1 = scmp.ne.s32.totalorder %s44_s12, %s3488_s14  ;;  %p3494_p3 = scmp.lt.s32.totalorder %s3488_s14, %s3488_s14 }
  0x29   :  { %p3495_p4 = por %p3494_p3, %p3493_p2 }
  0x2b   :  { %p3496_p5 = pnand %p3495_p4, %p3489_p1 }
  0x2d   :  { %3499 = shalt.err (!%p3496_p5)
}
  0x2e   :  { %49 = dma.hbm_to_vmem [thread:$0]  %s4250_s2, 3072, %s44_s12, [#allocation6], %s3553_s30, %s3553_s30, %s3554_s6  }
  0x2f   :  { %s3508_s0 = scalar_lea.vmem %s68_s3, 3072  ;;  %p3513_p7 = scmp.lt.s32.totalorder %s68_s3, %s68_s3 }
  0x30   :  { %p3509_p6 = scmp.ne.s32.totalorder %s68_s3, %s3508_s0  ;;  %p3514_p8 = scmp.lt.s32.totalorder %s3508_s0, %s3508_s0 }
  0x32   :  { %p3515_p9 = por %p3514_p8, %p3513_p7 }
  0x34   :  { %p3516_p10 = pnand %p3515_p9, %p3509_p6 }
  0x36   :  { %3519 = shalt.err (!%p3516_p10)
}
  0x37   :  { %73 = dma.hbm_to_vmem [thread:$0]  %s4252_s4, 3072, %s68_s3, [#allocation9], %s3553_s30, %s3553_s30, %s3554_s6  }
  0x38   :  { %3540 = dma.done.wait [#allocation3], 1024  }
  0x39   :  { %3541 = vsyncadd [#allocation3], 4294966272 }
  0x3a   :  { %3542 = dma.done.wait [#allocation6], 5120  }
  0x3b   :  { %3543 = vsyncadd [#allocation6], 4294962176 }
  0x3c   :  { %3544 = dma.done.wait [#allocation9], 6144  }
  0x3d   :  { %3545 = vsyncadd [#allocation9], 4294961152  ;;  %v3618_v0 = vld [vmem:[#allocation5 + $0x70] sm:$0xff]  ;;  %v3620_v1 = vld [vmem:[#allocation5 + $0x78] sm:$0xff]  ;;  %s3557_s2 = smov [#allocation11]  }
  0x3e   :  { %v3622_v2 = vld [vmem:[#allocation5 + $0x60] sm:$0xff]  ;;  %v3626_v3 = vpack.c.bf16 %v3620_v1, %v3618_v0  ;;  %v3628_v4 = vld [vmem:[#allocation5 + $0x68] sm:$0xff]  ;;  %v3634_v6 = vld [vmem:[#allocation5 + $0x50] sm:$0xff]  ;;  %s2492_s4 = sshll.u32 %s3557_s2, 4  ;;  %s2493_s4 = int_to_ptr.vmem [resolvable:$true] %s2492_s4 }
  0x3f   :  { %v3632_v5 = vpack.c.bf16 %v3628_v4, %v3622_v2  ;;  %v3636_v7 = vld [vmem:[#allocation5 + $0x58] sm:$0xff]  ;;  %v3640_v8 = vld [vmem:[#allocation5 + $0x40] sm:$0xff]  ;;  %v3647_v10 = vld [vmem:[#allocation5 + $0x48] sm:$0xff]  ;;  %s3520_s19 = scalar_lea.vmem %s2493_s4, 2048  ;;  %p3525_p12 = scmp.lt.s32.totalorder %s2493_s4, %s2493_s4 }
  0x40   :  { %2826 = vmatprep.subr.bf16.mxu0 %v3626_v3  ;;  %v3645_v9 = vpack.c.bf16 %v3636_v7, %v3634_v6  ;;  %v3649_v11 = vld [vmem:[#allocation2] sm:$0xff]   ;;  %v3656_v12 = vpack.c.bf16 %v3647_v10, %v3640_v8  ;;  %v3658_v13 = vld [vmem:[#allocation5 + $0x30] sm:$0xff]  ;;  %v3660_v14 = vld [vmem:[#allocation5 + $0x38] sm:$0xff]  ;;  %p3521_p11 = scmp.ne.s32.totalorder %s2493_s4, %s3520_s19  ;;  %p3526_p13 = scmp.lt.s32.totalorder %s3520_s19, %s3520_s19 }
  0x41   :  { %2827 = vmatpush3.bf16.msra.mxu0 %v3626_v3  ;;  %2842 = vmatprep.mubr.bf16.mxu0 %v3649_v11  ;;  %v3663_v15 = vld [vmem:[#allocation5 + $0x20] sm:$0xff]  ;;  %v3668_v16 = vpack.c.bf16 %v3660_v14, %v3658_v13  ;;  %v3670_v17 = vld [vmem:[#allocation5 + $0x28] sm:$0xff]  ;;  %v3340_v18 = vld [vmem:[#allocation7 + $0x78] sm:$0xff]  }
  0x42   :  { %2828 = vmatprep.subr.bf16.mxu0 %v3632_v5  ;;  %v3673_v19 = vld [vmem:[#allocation5 + $0x10] sm:$0xff]  ;;  %2858 = vmatprep.subr.bf16.mxu1 %v3340_v18  ;;  %v3678_v21 = vpack.c.bf16 %v3670_v17, %v3663_v15  ;;  %v3680_v22 = vld [vmem:[#allocation5 + $0x18] sm:$0xff]  ;;  %v3344_v23 = vld [vmem:[#allocation7 + $0x68] sm:$0xff]   ;;  %p3527_p0 = por %p3526_p13, %p3525_p12 }
  0x43   :  { %v3342_v20 = vld [vmem:[#allocation7 + $0x70] sm:$0xff]   ;;  %2859 = vmatpush3.bf16.msra.mxu1 %v3340_v18  ;;  %v3683_v24 = vld [vmem:[#allocation5] sm:$0xff]  ;;  %v3688_v25 = vpack.c.bf16 %v3680_v22, %v3673_v19  ;;  %v3690_v26 = vld [vmem:[#allocation5 + $0x8] sm:$0xff] }
  0x44   :  { %2860 = vmatprep.subr.bf16.mxu1 %v3342_v20  ;;  %v3346_v27 = vld [vmem:[#allocation7 + $0x60] sm:$0xff]   ;;  %v106_v28 = vpack.c.bf16 %v3690_v26, %v3683_v24  ;;  %v3348_v29 = vld [vmem:[#allocation7 + $0x58] sm:$0xff]   ;;  %v3350_v31 = vld [vmem:[#allocation7 + $0x50] sm:$0xff]   ;;  %p3528_p1 = pnand %p3527_p0, %p3521_p11 }
  0x45   :  { %2829 = vmatpush3.bf16.msra.mxu0 %v3632_v5  ;;  %v3341_v30 = vld [vmem:[#allocation7 + $0x38] sm:$0xff]   ;;  %v3697_v32 = vld [vmem:[#allocation2 + $0x8] sm:$0xff]   ;;  %v3699_v33 = vld [vmem:[#allocation2 + $0x10] sm:$0xff]  }
  0x46   :  { %2830 = vmatprep.subr.bf16.mxu0 %v3645_v9  ;;  %v3343_v34 = vld [vmem:[#allocation7 + $0x30] sm:$0xff]   ;;  %v3345_v35 = vld [vmem:[#allocation7 + $0x28] sm:$0xff]   ;;  %v3703_v36 = vld [vmem:[#allocation2 + $0x18] sm:$0xff]  }
  0x47   :  { %2861 = vmatpush3.bf16.msra.mxu1 %v3342_v20  ;;  %v3705_v37 = vld [vmem:[#allocation2 + $0x20] sm:$0xff]   ;;  %v3349_v39 = vld [vmem:[#allocation7 + $0x18] sm:$0xff]   ;;  %v3709_v40 = vld [vmem:[#allocation2 + $0x28] sm:$0xff]  }
  0x48   :  { %2862 = vmatprep.subr.bf16.mxu1 %v3344_v23  ;;  %v3347_v38 = vld [vmem:[#allocation7 + $0x20] sm:$0xff]   ;;  %v3711_v41 = vld [vmem:[#allocation2 + $0x30] sm:$0xff]   ;;  %v3715_v43 = vld [vmem:[#allocation2 + $0x38] sm:$0xff]  }
  0x49   :  { %2831 = vmatpush3.bf16.msra.mxu0 %v3645_v9  ;;  %v3351_v42 = vld [vmem:[#allocation7 + $0x10] sm:$0xff]   ;;  %4266 = vst [vmem:[#allocation16_spill] sm:$0xff] %v3715_v43  ;;  %v3352_v44 = vld [vmem:[#allocation7 + $0x48] sm:$0xff]   ;;  %v3354_v46 = vld [vmem:[#allocation7 + $0x40] sm:$0xff]  }
  0x4a   :  { %2832 = vmatprep.subr.bf16.mxu0 %v3656_v12  ;;  %v3353_v45 = vld [vmem:[#allocation7 + $0x8] sm:$0xff]   ;;  %v3355_v47 = vld [vmem:[#allocation7] sm:$0xff]  }
  0x4b   :  { %2863 = vmatpush3.bf16.msra.mxu1 %v3344_v23  ;;  %v3356_v23 = vld [vmem:[#allocation7 + $0xb8] sm:$0xff]  }
  0x4c   :  { %2864 = vmatprep.subr.bf16.mxu1 %v3346_v27 }
  0x4d   :  { %2833 = vmatpush3.bf16.msra.mxu0 %v3656_v12 }
  0x4e   :  { %2834 = vmatprep.subr.bf16.mxu0 %v3668_v16 }
  0x4f   :  { %2865 = vmatpush3.bf16.msra.mxu1 %v3346_v27  ;;  %v3358_v27 = vld [vmem:[#allocation7 + $0xa8] sm:$0xff]  }
  0x50   :  { %2866 = vmatprep.subr.bf16.mxu1 %v3348_v29 }
  0x51   :  { %2835 = vmatpush3.bf16.msra.mxu0 %v3668_v16 }
  0x52   :  { %2836 = vmatprep.subr.bf16.mxu0 %v3678_v21 }
  0x53   :  { %2867 = vmatpush3.bf16.msra.mxu1 %v3348_v29  ;;  %v3360_v29 = vld [vmem:[#allocation7 + $0x98] sm:$0xff]  }
  0x54   :  { %2868 = vmatprep.subr.bf16.mxu1 %v3350_v31 }
  0x55   :  { %2837 = vmatpush3.bf16.msra.mxu0 %v3678_v21 }
  0x56   :  { %2838 = vmatprep.subr.bf16.mxu0 %v3688_v25 }
  0x57   :  { %2869 = vmatpush3.bf16.msra.mxu1 %v3350_v31  ;;  %v3362_v31 = vld [vmem:[#allocation7 + $0x88] sm:$0xff]  }
  0x58   :  { %2870 = vmatprep.subr.bf16.mxu1 %v3352_v44 }
  0x59   :  { %2839 = vmatpush3.bf16.msra.mxu0 %v3688_v25 }
  0x5a   :  { %2840 = vmatprep.subr.bf16.mxu0 %v106_v28 }
  0x5b   :  { %2871 = vmatpush3.bf16.msra.mxu1 %v3352_v44 }
  0x5c   :  { %2872 = vmatprep.subr.bf16.mxu1 %v3354_v46 }
  0x5d   :  { %2841 = vmatpush3.bf16.msra.mxu0 %v106_v28 }
  0x5e   :  { %2890 = vmatprep.subr.bf16.mxu0 %v3341_v30 }
  0x5f   :  { %2873 = vmatpush3.bf16.msra.mxu1 %v3354_v46 }
  0x60   :  { %2843 = vmatmul.mubr.bf16.vlgmr.msra.gmra.mxu0 %v3697_v32 }
  0x61   :  { %2846 = vmatprep.mubr.bf16.mxu0 %v3699_v33  ;;  %2891 = vmatpush3.bf16.msra.mxu0 %v3341_v30  ;;  %v3361_v30 = vld [vmem:[#allocation7 + $0x90] sm:$0xff]  }
  0x62   :  { %2892 = vmatprep.subr.bf16.mxu0 %v3343_v34 }
  0x65   :  { %2893 = vmatpush3.bf16.msra.mxu0 %v3343_v34 }
  0x66   :  { %2894 = vmatprep.subr.bf16.mxu0 %v3345_v35 }
  0x68   :  { %2847 = vmatmul.mubr.bf16.gmra.mxu0 %v3703_v36 }
  0x69   :  { %2850 = vmatprep.mubr.bf16.mxu0 %v3705_v37  ;;  %2895 = vmatpush3.bf16.msra.mxu0 %v3345_v35 }
  0x6a   :  { %2896 = vmatprep.subr.bf16.mxu0 %v3347_v38 }
  0x6d   :  { %2897 = vmatpush3.bf16.msra.mxu0 %v3347_v38 }
  0x6e   :  { %2898 = vmatprep.subr.bf16.mxu0 %v3349_v39 }
  0x70   :  { %2851 = vmatmul.mubr.bf16.gmra.mxu0 %v3709_v40 }
  0x71   :  { %2854 = vmatprep.mubr.bf16.mxu0 %v3711_v41  ;;  %2899 = vmatpush3.bf16.msra.mxu0 %v3349_v39 }
  0x72   :  { %2900 = vmatprep.subr.bf16.mxu0 %v3351_v42 }
  0x75   :  { %2901 = vmatpush3.bf16.msra.mxu0 %v3351_v42 }
  0x76   :  { %2902 = vmatprep.subr.bf16.mxu0 %v3353_v45 }
  0x78   :  { %2855 = vmatmul.mubr.bf16.gmra.mxu0 %v3715_v43 }
  0x79   :  { %2906 = vmatprep.mubr.bf16.mxu0 %v106_v28  ;;  %2903 = vmatpush3.bf16.msra.mxu0 %v3353_v45  ;;  %v3359_v28 = vld [vmem:[#allocation7 + $0xa0] sm:$0xff]  }
  0x7a   :  { %2904 = vmatprep.subr.bf16.mxu0 %v3355_v47 }
  0x7d   :  { %2905 = vmatpush3.bf16.msra.mxu0 %v3355_v47 }
  0x7e   :  { %2954 = vmatprep.subr.bf16.mxu0 %v3356_v23 }
  0x80   :  { %2907 = vmatmul.mubr.bf16.vlgmr.msra.gmra.mxu0 %v3688_v25  ;;  %v3357_v25 = vld [vmem:[#allocation7 + $0xb0] sm:$0xff]  }
  0x81   :  { %2910 = vmatprep.mubr.bf16.mxu0 %v3678_v21  ;;  %2955 = vmatpush3.bf16.msra.mxu0 %v3356_v23 }
  0x82   :  { %2956 = vmatprep.subr.bf16.mxu0 %v3357_v25 }
  0x85   :  { %2957 = vmatpush3.bf16.msra.mxu0 %v3357_v25 }
  0x86   :  { %2958 = vmatprep.subr.bf16.mxu0 %v3358_v27 }
  0x88   :  { %2911 = vmatmul.mubr.bf16.gmra.mxu0 %v3668_v16 }
  0x89   :  { %2914 = vmatprep.mubr.bf16.mxu0 %v3656_v12  ;;  %2959 = vmatpush3.bf16.msra.mxu0 %v3358_v27 }
  0x8a   :  { %2960 = vmatprep.subr.bf16.mxu0 %v3359_v28 }
  0x8d   :  { %2961 = vmatpush3.bf16.msra.mxu0 %v3359_v28 }
  0x8e   :  { %2962 = vmatprep.subr.bf16.mxu0 %v3360_v29 }
  0x90   :  { %2915 = vmatmul.mubr.bf16.gmra.mxu0 %v3645_v9 }
  0x91   :  { %2918 = vmatprep.mubr.bf16.mxu0 %v3632_v5  ;;  %2963 = vmatpush3.bf16.msra.mxu0 %v3360_v29 }
  0x92   :  { %2964 = vmatprep.subr.bf16.mxu0 %v3361_v30 }
  0x95   :  { %2965 = vmatpush3.bf16.msra.mxu0 %v3361_v30 }
  0x96   :  { %2966 = vmatprep.subr.bf16.mxu0 %v3362_v31 }
  0x98   :  { %2919 = vmatmul.mubr.bf16.gmra.mxu0 %v3626_v3 }
  0x99   :  { %2967 = vmatpush3.bf16.msra.mxu0 %v3362_v31 }
 0x120   :  { %v2844_v48 = vpop.f32.mrf.mxu0 }
 0x122   :  { %v228_v49 = vpop.f32.mrf.mxu0 }
 0x124   :  { %v2845_v50 = vpop.f32.mrf.mxu0 }
 0x125   :  { %v292_v53 = vpack.c.bf16 %v2845_v50, %v2844_v48 }
 0x126   :  { %v231_v51 = vpop.f32.mrf.mxu0 }
 0x127   :  { %v291_v52 = vpack.c.bf16 %v231_v51, %v228_v49 }
 0x128   :  { %v2848_v54 = vpop.f32.mrf.mxu0 }
 0x129   :  { %2874 = vmatprep.mubr.bf16.mxu1 %v291_v52 }
 0x12a   :  { %v244_v55 = vpop.f32.mrf.mxu0  ;;  %2875 = vmatmul.mubr.bf16.vlgmr.msra.gmra.mxu1 %v292_v53 }
 0x12c   :  { %v2849_v56 = vpop.f32.mrf.mxu0 }
 0x12d   :  { %v294_v59 = vpack.c.bf16 %v2849_v56, %v2848_v54 }
 0x12e   :  { %v247_v57 = vpop.f32.mrf.mxu0 }
 0x12f   :  { %v293_v58 = vpack.c.bf16 %v247_v57, %v244_v55 }
 0x130   :  { %v2852_v60 = vpop.f32.mrf.mxu0 }
 0x131   :  { %2878 = vmatprep.mubr.bf16.mxu1 %v293_v58 }
 0x132   :  { %v260_v61 = vpop.f32.mrf.mxu0  ;;  %2879 = vmatmul.mubr.bf16.gmra.mxu1 %v294_v59 }
 0x134   :  { %v2853_v62 = vpop.f32.mrf.mxu0 }
 0x135   :  { %v296_v5 = vpack.c.bf16 %v2853_v62, %v2852_v60 }
 0x136   :  { %v263_v63 = vpop.f32.mrf.mxu0 }
 0x137   :  { %v295_v3 = vpack.c.bf16 %v263_v63, %v260_v61 }
 0x138   :  { %v2856_v9 = vpop.f32.mrf.mxu0 }
 0x139   :  { %2882 = vmatprep.mubr.bf16.mxu1 %v295_v3 }
 0x13a   :  { %v276_v12 = vpop.f32.mrf.mxu0  ;;  %2883 = vmatmul.mubr.bf16.gmra.mxu1 %v296_v5 }
 0x13c   :  { %v2857_v16 = vpop.f32.mrf.mxu0 }
 0x13d   :  { %v298_v18 = vpack.c.bf16 %v2857_v16, %v2856_v9 }
 0x13e   :  { %v279_v20 = vpop.f32.mrf.mxu0 }
 0x13f   :  { %v297_v21 = vpack.c.bf16 %v279_v20, %v276_v12  ;;  %2922 = vmatprep.subr.bf16.mxu1 %v298_v18 }
 0x140   :  { %2923 = vmatpush3.bf16.msra.mxu1 %v298_v18  ;;  %v3734_v34 = vpop.f32.mrf.mxu0 }
 0x141   :  { %2886 = vmatprep.mubr.bf16.mxu1 %v297_v21  ;;  %2924 = vmatprep.subr.bf16.mxu1 %v297_v21 }
 0x142   :  { %2887 = vmatmul.mubr.bf16.gmra.mxu1 %v298_v18  ;;  %v3736_v35 = vpop.f32.mrf.mxu0 }
 0x143   :  { %2938 = vmatprep.mubr.bf16.mxu1 %v3649_v11 }
 0x144   :  { %2925 = vmatpush3.bf16.msra.mxu1 %v297_v21  ;;  %v3738_v38 = vpop.f32.mrf.mxu0 }
 0x145   :  { %2926 = vmatprep.subr.bf16.mxu1 %v296_v5 }
 0x146   :  { %v3744_v44 = vpop.f32.mrf.mxu0 }
 0x148   :  { %2927 = vmatpush3.bf16.msra.mxu1 %v296_v5  ;;  %v2912_v47 = vpop.f32.mrf.mxu0 }
 0x149   :  { %2928 = vmatprep.subr.bf16.mxu1 %v295_v3 }
 0x14c   :  { %2929 = vmatpush3.bf16.msra.mxu1 %v295_v3 }
 0x14d   :  { %2930 = vmatprep.subr.bf16.mxu1 %v294_v59 }
 0x150   :  { %2931 = vmatpush3.bf16.msra.mxu1 %v294_v59 }
 0x151   :  { %2932 = vmatprep.subr.bf16.mxu1 %v293_v58 }
 0x154   :  { %2933 = vmatpush3.bf16.msra.mxu1 %v293_v58 }
 0x155   :  { %2934 = vmatprep.subr.bf16.mxu1 %v292_v53 }
 0x158   :  { %2935 = vmatpush3.bf16.msra.mxu1 %v292_v53 }
 0x159   :  { %2936 = vmatprep.subr.bf16.mxu1 %v291_v52 }
 0x15c   :  { %2937 = vmatpush3.bf16.msra.mxu1 %v291_v52 }
 0x15f   :  { %2939 = vmatmul.mubr.bf16.vlgmr.msra.gmra.mxu1 %v3697_v32 }
 0x160   :  { %2942 = vmatprep.mubr.bf16.mxu1 %v3699_v33 }
 0x167   :  { %2943 = vmatmul.mubr.bf16.gmra.mxu1 %v3703_v36 }
 0x168   :  { %2946 = vmatprep.mubr.bf16.mxu1 %v3705_v37 }
 0x16f   :  { %2947 = vmatmul.mubr.bf16.gmra.mxu1 %v3709_v40 }
 0x170   :  { %2950 = vmatprep.mubr.bf16.mxu1 %v3711_v41 }
 0x177   :  { %2951 = vmatmul.mubr.bf16.gmra.mxu1 %v3715_v43 }
 0x178   :  { %3002 = vmatprep.mubr.bf16.mxu1 %v3649_v11  ;;  %v3363_v11 = vld [vmem:[#allocation7 + $0x80] sm:$0xff]  }
 0x179   :  { %2968 = vmatprep.subr.bf16.mxu0 %v3363_v11 }
 0x17a   :  { %2969 = vmatpush3.bf16.msra.mxu0 %v3363_v11 }
 0x1ea   :  { %v3740_v39 = vpop.f32.mrf.mxu1 }
 0x1ec   :  { %v3742_v42 = vpop.f32.mrf.mxu1 }
 0x1ee   :  { %v3746_v45 = vpop.f32.mrf.mxu1 }
 0x1f0   :  { %v3748_v46 = vpop.f32.mrf.mxu1 }
 0x1f2   :  { %v2880_v48 = vpop.f32.mrf.mxu1 }
 0x1f3   :  { %v3750_v49 = vadd.f32 %v2912_v47, %v2880_v48 }
 0x1f4   :  { %v3752_v50 = vpop.f32.mrf.mxu1 }
 0x1f6   :  { %v3754_v51 = vpop.f32.mrf.mxu1 }
 0x1f8   :  { %v3756_v52 = vpop.f32.mrf.mxu1 }
 0x1fa   :  { %v3758_v53 = vpop.f32.mrf.mxu1 }
 0x1fc   :  { %v3760_v54 = vpop.f32.mrf.mxu1 }
 0x1fe   :  { %v3762_v55 = vpop.f32.mrf.mxu1 }
 0x200   :  { %v3764_v56 = vpop.f32.mrf.mxu1 }
 0x202   :  { %v3766_v57 = vpop.f32.mrf.mxu1 }
 0x204   :  { %v3768_v58 = vpop.f32.mrf.mxu1 }
 0x206   :  { %v3770_v59 = vpop.f32.mrf.mxu1 }
 0x208   :  { %v3772_v60 = vpop.f32.mrf.mxu1 }
 0x21f   :  { %v2940_v61 = vpop.f32.mrf.mxu1 }
 0x220   :  { %v705_v9 = vmul.f32 2.0, %v2940_v61 }
 0x221   :  { %v640_v62 = vpop.f32.mrf.mxu1 }
 0x222   :  { %v703_v3 = vmul.f32 2.0, %v640_v62  ;;  %v721_v25 = vsub.f32 %v705_v9, %v3673_v19 }
 0x223   :  { %v2941_v63 = vpop.f32.mrf.mxu1 }
 0x224   :  { %v706_v5 = vmul.f32 2.0, %v2941_v63  ;;  %v719_v21 = vsub.f32 %v703_v3, %v3683_v24 }
 0x225   :  { %v643_v12 = vpop.f32.mrf.mxu1 }
 0x226   :  { %v704_v16 = vmul.f32 2.0, %v643_v12  ;;  %v722_v18 = vsub.f32 %v706_v5, %v3680_v22 }
 0x227   :  { %v2944_v20 = vpop.f32.mrf.mxu1 }
 0x228   :  { %v720_v23 = vsub.f32 %v704_v16, %v3690_v26  ;;  %v736_v29 = vpack.c.bf16 %v722_v18, %v721_v25  ;;  %v709_v47 = vmul.f32 2.0, %v2944_v20 }
 0x229   :  { %v656_v27 = vpop.f32.mrf.mxu1 }
 0x22a   :  { %v735_v28 = vpack.c.bf16 %v720_v23, %v719_v21  ;;  %v707_v31 = vmul.f32 2.0, %v656_v27  ;;  %v725_v19 = vsub.f32 %v709_v47, %v3658_v13 }
 0x22b   :  { %v2945_v30 = vpop.f32.mrf.mxu1 }
 0x22c   :  { %v710_v11 = vmul.f32 2.0, %v2945_v30  ;;  %2970 = vmatprep.mubr.bf16.mxu0 %v735_v28  ;;  %v723_v24 = vsub.f32 %v707_v31, %v3663_v15 }
 0x22d   :  { %v659_v48 = vpop.f32.mrf.mxu1  ;;  %2971 = vmatmul.mubr.bf16.vlgmr.msra.gmra.mxu0 %v736_v29 }
 0x22e   :  { %v708_v61 = vmul.f32 2.0, %v659_v48  ;;  %v726_v22 = vsub.f32 %v710_v11, %v3660_v14 }
 0x22f   :  { %v2948_v62 = vpop.f32.mrf.mxu1 }
 0x230   :  { %v724_v26 = vsub.f32 %v708_v61, %v3670_v17  ;;  %v738_v9 = vpack.c.bf16 %v726_v22, %v725_v19  ;;  %v713_v18 = vmul.f32 2.0, %v2948_v62  ;;  %v3790_v62 = vpop.f32.mrf.mxu0 }
 0x231   :  { %v672_v63 = vpop.f32.mrf.mxu1 }
 0x232   :  { %v737_v3 = vpack.c.bf16 %v724_v26, %v723_v24  ;;  %v711_v12 = vmul.f32 2.0, %v672_v63  ;;  %v729_v13 = vsub.f32 %v713_v18, %v3634_v6  ;;  %v3792_v24 = vpop.f32.mrf.mxu0 }
 0x233   :  { %v2949_v5 = vpop.f32.mrf.mxu1 }
 0x234   :  { %v714_v16 = vmul.f32 2.0, %v2949_v5  ;;  %2974 = vmatprep.mubr.bf16.mxu0 %v737_v3  ;;  %v727_v15 = vsub.f32 %v711_v12, %v3640_v8  ;;  %v3794_v26 = vpop.f32.mrf.mxu0  ;;  %v3373_v12 = vld [vmem:[#allocation8 + $0x70] sm:$0xff]  }
 0x235   :  { %v675_v20 = vpop.f32.mrf.mxu1  ;;  %2975 = vmatmul.mubr.bf16.gmra.mxu0 %v738_v9 }
 0x236   :  { %v712_v21 = vmul.f32 2.0, %v675_v20  ;;  %v730_v14 = vsub.f32 %v714_v16, %v3636_v7  ;;  %v2916_v19 = vpop.f32.mrf.mxu0  ;;  %v3374_v16 = vld [vmem:[#allocation8 + $0x68] sm:$0xff]  }
 0x237   :  { %v2952_v23 = vpop.f32.mrf.mxu1 }
 0x238   :  { %v728_v17 = vsub.f32 %v712_v21, %v3647_v10  ;;  %v740_v29 = vpack.c.bf16 %v730_v14, %v729_v13  ;;  %v717_v11 = vmul.f32 2.0, %v2952_v23  ;;  %v575_v63 = vpop.f32.mrf.mxu0  ;;  %v3375_v21 = vld [vmem:[#allocation8 + $0x60] sm:$0xff]  }
 0x239   :  { %v688_v25 = vpop.f32.mrf.mxu1 }
 0x23a   :  { %v739_v27 = vpack.c.bf16 %v728_v17, %v727_v15  ;;  %v715_v30 = vmul.f32 2.0, %v688_v25  ;;  %v733_v10 = vsub.f32 %v717_v11, %v3618_v0  ;;  %v2917_v3 = vpop.f32.mrf.mxu0  ;;  %v3376_v15 = vld [vmem:[#allocation8 + $0x58] sm:$0xff]   ;;  %v3377_v25 = vld [vmem:[#allocation8 + $0x50] sm:$0xff]  }
 0x23b   :  { %v2953_v28 = vpop.f32.mrf.mxu1 }
 0x23c   :  { %v718_v31 = vmul.f32 2.0, %v2953_v28  ;;  %2978 = vmatprep.mubr.bf16.mxu0 %v739_v27  ;;  %v731_v61 = vsub.f32 %v715_v30, %v3622_v2 }
 0x23d   :  { %v691_v47 = vpop.f32.mrf.mxu1  ;;  %2979 = vmatmul.mubr.bf16.gmra.mxu0 %v740_v29 }
 0x23e   :  { %v716_v48 = vmul.f32 2.0, %v691_v47  ;;  %v734_v7 = vsub.f32 %v718_v31, %v3620_v1  ;;  %v578_v1 = vpop.f32.mrf.mxu0 }
 0x240   :  { %v732_v8 = vsub.f32 %v716_v48, %v3628_v4  ;;  %v742_v22 = vpack.c.bf16 %v734_v7, %v733_v10  ;;  %v2920_v5 = vpop.f32.mrf.mxu0  ;;  %v3372_v4 = vld [vmem:[#allocation8 + $0x78] sm:$0xff]  }
 0x241   :  { %3018 = vmatprep.subr.bf16.mxu0 %v3372_v4  ;;  %v600_v48 = vadd.f32 %v2920_v5, %v3766_v57 }
 0x242   :  { %v741_v6 = vpack.c.bf16 %v732_v8, %v731_v61  ;;  %v591_v2 = vpop.f32.mrf.mxu0  ;;  %3019 = vmatpush3.bf16.msra.mxu0 %v3372_v4 }
 0x243   :  { %3020 = vmatprep.subr.bf16.mxu0 %v3373_v12  ;;  %v592_v61 = vadd.f32 %v591_v2, %v3768_v58  ;;  %v579_v58 = vadd.f32 %v578_v1, %v3764_v56  ;;  %v571_v56 = vadd.f32 %v3792_v24, %v3754_v51  ;;  %v560_v24 = vadd.f32 %v3790_v62, %v3752_v50 }
 0x244   :  { %2982 = vmatprep.mubr.bf16.mxu0 %v741_v6  ;;  %v2921_v9 = vpop.f32.mrf.mxu0  ;;  %v552_v50 = vadd.f32 %v3734_v34, %v3740_v39  ;;  %v544_v34 = vadd.f32 %v3736_v35, %v3742_v42 }
 0x245   :  { %2983 = vmatmul.mubr.bf16.gmra.mxu0 %v742_v22  ;;  %v603_v8 = vadd.f32 %v2921_v9, %v3770_v59  ;;  %v587_v22 = vadd.f32 %v2917_v3, %v3762_v55 }
 0x246   :  { %v594_v0 = vpop.f32.mrf.mxu0  ;;  %3021 = vmatpush3.bf16.msra.mxu0 %v3373_v12 }
 0x247   :  { %3022 = vmatprep.subr.bf16.mxu0 %v3374_v16  ;;  %v595_v4 = vadd.f32 %v594_v0, %v3772_v60 }
 0x24a   :  { %3023 = vmatpush3.bf16.msra.mxu0 %v3374_v16 }
 0x24b   :  { %3024 = vmatprep.subr.bf16.mxu0 %v3375_v21 }
 0x24e   :  { %3025 = vmatpush3.bf16.msra.mxu0 %v3375_v21  ;;  %v584_v21 = vadd.f32 %v2916_v19, %v3758_v53  ;;  %v576_v53 = vadd.f32 %v575_v63, %v3760_v54 }
 0x24f   :  { %3026 = vmatprep.subr.bf16.mxu0 %v3376_v15 }
 0x252   :  { %3027 = vmatpush3.bf16.msra.mxu0 %v3376_v15 }
 0x253   :  { %3028 = vmatprep.subr.bf16.mxu0 %v3377_v25 }
 0x256   :  { %3029 = vmatpush3.bf16.msra.mxu0 %v3377_v25 }
 0x2ed   :  { %v3796_v18 = vpop.f32.mrf.mxu0 }
 0x2ef   :  { %v3798_v20 = vpop.f32.mrf.mxu0 }
 0x2f1   :  { %v3800_v14 = vpop.f32.mrf.mxu0 }
 0x2f3   :  { %v3802_v23 = vpop.f32.mrf.mxu0 }
 0x2f5   :  { %v2976_v17 = vpop.f32.mrf.mxu0 }
 0x2f7   :  { %v858_v13 = vpop.f32.mrf.mxu0 }
 0x2f9   :  { %v2977_v27 = vpop.f32.mrf.mxu0 }
 0x2fa   :  { %v912_v54 = vadd.f32 %v2977_v27, %v571_v56 }
 0x2fb   :  { %v861_v28 = vpop.f32.mrf.mxu0 }
 0x2fc   :  { %v3852_v27 = vmax.f32 %v912_v54, 0.0 }
 0x2fd   :  { %v2980_v29 = vpop.f32.mrf.mxu0 }
 0x2fe   :  { %v915_v59 = vadd.f32 %v2980_v29, %v584_v21 }
 0x2ff   :  { %v874_v30 = vpop.f32.mrf.mxu0 }
 0x300   :  { %v3834_v1 = vmax.f32 %v915_v59, 0.0  ;;  %v913_v0 = vadd.f32 %v874_v30, %v576_v53 }
 0x301   :  { %v2981_v31 = vpop.f32.mrf.mxu0 }
 0x302   :  { %v916_v25 = vadd.f32 %v2981_v31, %v587_v22  ;;  %v563_v31 = vadd.f32 %v3794_v26, %v3756_v52  ;;  %v3847_v51 = vmax.f32 %v913_v0, 0.0  ;;  %v555_v52 = vadd.f32 %v3738_v38, %v3746_v45  ;;  %v4272_v22 = vld [vmem:[#allocation16_spill] sm:$0xff] }
 0x303   :  { %v877_v11 = vpop.f32.mrf.mxu0  ;;  %v909_v26 = vadd.f32 %v858_v13, %v560_v24  ;;  %v547_v38 = vadd.f32 %v3744_v44, %v3748_v46  ;;  %v907_v45 = vadd.f32 %v3796_v18, %v552_v50  ;;  %v905_v44 = vadd.f32 %v3798_v20, %v544_v34  ;;  %v3366_v20 = vld [vmem:[#allocation8 + $0x28] sm:$0xff]   ;;  %v3380_v34 = vld [vmem:[#allocation8 + $0xb8] sm:$0xff]  }
 0x304   :  { %v3824_v60 = vmax.f32 %v916_v25, 0.0  ;;  %v914_v19 = vadd.f32 %v877_v11, %v579_v58  ;;  %v911_v11 = vadd.f32 %v2976_v17, %v3750_v49  ;;  %v910_v30 = vadd.f32 %v861_v28, %v563_v31 }
 0x305   :  { %v2984_v47 = vpop.f32.mrf.mxu0  ;;  %v908_v62 = vadd.f32 %v3800_v14, %v555_v52  ;;  %v3875_v13 = vmax.f32 %v909_v26, 0.0  ;;  %v906_v14 = vadd.f32 %v3802_v23, %v547_v38  ;;  %v3891_v35 = vmax.f32 %v905_v44, 0.0  ;;  %v3364_v23 = vld [vmem:[#allocation8 + $0x38] sm:$0xff]   ;;  %v3909_v38 = vld [vmem:[#allocation2 + $0x8] sm:$0xff]   ;;  %v3383_v44 = vld [vmem:[#allocation8 + $0xa0] sm:$0xff]  }
 0x306   :  { %v919_v10 = vadd.f32 %v2984_v47, %v600_v48  ;;  %v3837_v63 = vmax.f32 %v914_v19, 0.0  ;;  %v3841_v29 = vpack.c.bf16 %v3824_v60, %v3834_v1  ;;  %v3861_v49 = vmax.f32 %v911_v11, 0.0  ;;  %4274 = vst [vmem:[#allocation22_spill] sm:$0xff] %v3909_v38 }
 0x307   :  { %v890_v7 = vpop.f32.mrf.mxu0  ;;  %v3867_v17 = vmax.f32 %v910_v30, 0.0  ;;  %4267 = vst [vmem:[#allocation17_spill] sm:$0xff] %v3875_v13  ;;  %v3879_v39 = vmax.f32 %v908_v62, 0.0  ;;  %v3887_v46 = vmax.f32 %v906_v14, 0.0  ;;  %4271 = vst [vmem:[#allocation21_spill] sm:$0xff] %v3891_v35  ;;  %v3381_v14 = vld [vmem:[#allocation8 + $0xb0] sm:$0xff]  }
 0x308   :  { %v917_v12 = vadd.f32 %v890_v7, %v592_v61  ;;  %v3810_v43 = vmax.f32 %v919_v10, 0.0  ;;  %v3856_v47 = vpack.c.bf16 %v3837_v63, %v3847_v51  ;;  %v940_v28 = vpack.c.bf16 %v3852_v27, %v3861_v49  ;;  %v3365_v61 = vld [vmem:[#allocation8 + $0x30] sm:$0xff]   ;;  %v3368_v10 = vld [vmem:[#allocation8 + $0x18] sm:$0xff]  }
 0x309   :  { %v2985_v6 = vpop.f32.mrf.mxu0  ;;  %4268 = vst [vmem:[#allocation18_spill] sm:$0xff] %v3879_v39  ;;  %v939_v48 = vpack.c.bf16 %v3867_v17, %v3875_v13  ;;  %v3884_v7 = vmax.f32 %v907_v45, 0.0  ;;  %4270 = vst [vmem:[#allocation20_spill] sm:$0xff] %v3887_v46  ;;  %v937_v42 = vpack.c.bf16 %v3887_v46, %v3891_v35  ;;  %v3912_v45 = vld [vmem:[#allocation2 + $0x10] sm:$0xff]  }
 0x30a   :  { %v920_v16 = vadd.f32 %v2985_v6, %v603_v8  ;;  %v3815_v2 = vmax.f32 %v917_v12, 0.0  ;;  %v3367_v8 = vld [vmem:[#allocation8 + $0x20] sm:$0xff]   ;;  %v3369_v6 = vld [vmem:[#allocation8 + $0x10] sm:$0xff]   ;;  %4275 = vst [vmem:[#allocation23_spill] sm:$0xff] %v3912_v45 }
 0x30b   :  { %v893_v15 = vpop.f32.mrf.mxu0  ;;  %4269 = vst [vmem:[#allocation19_spill] sm:$0xff] %v3884_v7  ;;  %v938_v18 = vpack.c.bf16 %v3879_v39, %v3884_v7  ;;  %v3379_v12 = vld [vmem:[#allocation8 + $0x40] sm:$0xff]  }
 0x30c   :  { %v3812_v57 = vmax.f32 %v920_v16, 0.0  ;;  %v918_v5 = vadd.f32 %v893_v15, %v595_v4  ;;  %v3378_v4 = vld [vmem:[#allocation8 + $0x48] sm:$0xff]  }
 0x30d   :  { %3030 = vmatprep.subr.bf16.mxu0 %v3378_v4 }
 0x30e   :  { %v3817_v9 = vmax.f32 %v918_v5, 0.0  ;;  %v3821_v55 = vpack.c.bf16 %v3812_v57, %v3810_v43  ;;  %3031 = vmatpush3.bf16.msra.mxu0 %v3378_v4 }
 0x30f   :  { %3032 = vmatprep.subr.bf16.mxu0 %v3379_v12 }
 0x310   :  { %2986 = vmatprep.subr.bf16.mxu1 %v3821_v55  ;;  %v3829_v3 = vpack.c.bf16 %v3817_v9, %v3815_v2 }
 0x311   :  { %2987 = vmatpush3.bf16.msra.mxu1 %v3821_v55 }
 0x312   :  { %2988 = vmatprep.subr.bf16.mxu1 %v3829_v3  ;;  %3033 = vmatpush3.bf16.msra.mxu0 %v3379_v12 }
 0x315   :  { %2989 = vmatpush3.bf16.msra.mxu1 %v3829_v3 }
 0x316   :  { %2990 = vmatprep.subr.bf16.mxu1 %v3841_v29 }
 0x319   :  { %2991 = vmatpush3.bf16.msra.mxu1 %v3841_v29 }
 0x31a   :  { %2992 = vmatprep.subr.bf16.mxu1 %v3856_v47 }
 0x31d   :  { %2993 = vmatpush3.bf16.msra.mxu1 %v3856_v47 }
 0x31e   :  { %2994 = vmatprep.subr.bf16.mxu1 %v940_v28 }
 0x321   :  { %2995 = vmatpush3.bf16.msra.mxu1 %v940_v28 }
 0x322   :  { %2996 = vmatprep.subr.bf16.mxu1 %v939_v48 }
 0x325   :  { %2997 = vmatpush3.bf16.msra.mxu1 %v939_v48 }
 0x326   :  { %2998 = vmatprep.subr.bf16.mxu1 %v938_v18 }
 0x329   :  { %2999 = vmatpush3.bf16.msra.mxu1 %v938_v18 }
 0x32a   :  { %3000 = vmatprep.subr.bf16.mxu1 %v937_v42 }
 0x32d   :  { %3001 = vmatpush3.bf16.msra.mxu1 %v937_v42 }
 0x32e   :  { %3050 = vmatprep.subr.bf16.mxu1 %v3364_v23 }
 0x330   :  { %3003 = vmatmul.mubr.bf16.vlgmr.msra.gmra.mxu1 %v3697_v32  ;;  %v3370_v32 = vld [vmem:[#allocation8 + $0x8] sm:$0xff]  }
 0x331   :  { %3051 = vmatpush3.bf16.msra.mxu1 %v3364_v23  ;;  %3006 = vmatprep.mubr.bf16.mxu1 %v3699_v33  ;;  %v3371_v33 = vld [vmem:[#allocation8] sm:$0xff]  }
 0x332   :  { %3052 = vmatprep.subr.bf16.mxu1 %v3365_v61 }
 0x335   :  { %3053 = vmatpush3.bf16.msra.mxu1 %v3365_v61 }
 0x336   :  { %3054 = vmatprep.subr.bf16.mxu1 %v3366_v20 }
 0x338   :  { %3007 = vmatmul.mubr.bf16.gmra.mxu1 %v3703_v36 }
 0x339   :  { %3055 = vmatpush3.bf16.msra.mxu1 %v3366_v20  ;;  %3010 = vmatprep.mubr.bf16.mxu1 %v3705_v37 }
 0x33a   :  { %3056 = vmatprep.subr.bf16.mxu1 %v3367_v8 }
 0x33d   :  { %3057 = vmatpush3.bf16.msra.mxu1 %v3367_v8 }
 0x33e   :  { %3058 = vmatprep.subr.bf16.mxu1 %v3368_v10 }
 0x340   :  { %3011 = vmatmul.mubr.bf16.gmra.mxu1 %v3709_v40 }
 0x341   :  { %3059 = vmatpush3.bf16.msra.mxu1 %v3368_v10  ;;  %3014 = vmatprep.mubr.bf16.mxu1 %v3711_v41 }
 0x342   :  { %3060 = vmatprep.subr.bf16.mxu1 %v3369_v6 }
 0x345   :  { %3061 = vmatpush3.bf16.msra.mxu1 %v3369_v6 }
 0x346   :  { %3062 = vmatprep.subr.bf16.mxu1 %v3370_v32 }
 0x348   :  { %3015 = vmatmul.mubr.bf16.gmra.mxu1 %v4272_v22 }
 0x349   :  { %3063 = vmatpush3.bf16.msra.mxu1 %v3370_v32  ;;  %3066 = vmatprep.mubr.bf16.mxu1 %v937_v42 }
 0x34a   :  { %3064 = vmatprep.subr.bf16.mxu1 %v3371_v33 }
 0x34d   :  { %3065 = vmatpush3.bf16.msra.mxu1 %v3371_v33 }
 0x34e   :  { %3114 = vmatprep.subr.bf16.mxu1 %v3380_v34 }
 0x350   :  { %3067 = vmatmul.mubr.bf16.vlgmr.msra.gmra.mxu1 %v938_v18 }
 0x351   :  { %3070 = vmatprep.mubr.bf16.mxu1 %v939_v48  ;;  %3115 = vmatpush3.bf16.msra.mxu1 %v3380_v34  ;;  %v3382_v48 = vld [vmem:[#allocation8 + $0xa8] sm:$0xff]  }
 0x352   :  { %3116 = vmatprep.subr.bf16.mxu1 %v3381_v14 }
 0x355   :  { %3117 = vmatpush3.bf16.msra.mxu1 %v3381_v14 }
 0x356   :  { %3118 = vmatprep.subr.bf16.mxu1 %v3382_v48 }
 0x358   :  { %3071 = vmatmul.mubr.bf16.gmra.mxu1 %v940_v28  ;;  %v3906_v28 = vld [vmem:[#allocation2] sm:$0xff]  }
 0x359   :  { %3074 = vmatprep.mubr.bf16.mxu1 %v3856_v47  ;;  %4273 = vst [vmem:[#allocation16_spill] sm:$0xff] %v3906_v28  ;;  %3119 = vmatpush3.bf16.msra.mxu1 %v3382_v48 }
 0x35a   :  { %3120 = vmatprep.subr.bf16.mxu1 %v3383_v44 }
 0x35d   :  { %3121 = vmatpush3.bf16.msra.mxu1 %v3383_v44 }
 0x360   :  { %3075 = vmatmul.mubr.bf16.gmra.mxu1 %v3841_v29 }
 0x361   :  { %3078 = vmatprep.mubr.bf16.mxu1 %v3829_v3 }
 0x368   :  { %3079 = vmatmul.mubr.bf16.gmra.mxu1 %v3821_v55 }
 0x3f0   :  { %v3004_v16 = vpop.f32.mrf.mxu1 }
 0x3f2   :  { %v995_v21 = vpop.f32.mrf.mxu1 }
 0x3f4   :  { %v3005_v15 = vpop.f32.mrf.mxu1 }
 0x3f5   :  { %v1059_v58 = vpack.c.bf16 %v3005_v15, %v3004_v16 }
 0x3f6   :  { %v998_v25 = vpop.f32.mrf.mxu1 }
 0x3f7   :  { %v1058_v5 = vpack.c.bf16 %v998_v25, %v995_v21 }
 0x3f8   :  { %v3008_v59 = vpop.f32.mrf.mxu1 }
 0x3f9   :  { %3034 = vmatprep.mubr.bf16.mxu0 %v1058_v5 }
 0x3fa   :  { %v1011_v53 = vpop.f32.mrf.mxu1  ;;  %3035 = vmatmul.mubr.bf16.vlgmr.msra.gmra.mxu0 %v1059_v58 }
 0x3fc   :  { %v3009_v19 = vpop.f32.mrf.mxu1 }
 0x3fd   :  { %v1061_v55 = vpack.c.bf16 %v3009_v19, %v3008_v59 }
 0x3fe   :  { %v1014_v3 = vpop.f32.mrf.mxu1 }
 0x3ff   :  { %v1060_v56 = vpack.c.bf16 %v1014_v3, %v1011_v53 }
 0x400   :  { %v3012_v0 = vpop.f32.mrf.mxu1 }
 0x401   :  { %3038 = vmatprep.mubr.bf16.mxu0 %v1060_v56 }
 0x402   :  { %v1027_v54 = vpop.f32.mrf.mxu1  ;;  %3039 = vmatmul.mubr.bf16.gmra.mxu0 %v1061_v55 }
 0x404   :  { %v3013_v29 = vpop.f32.mrf.mxu1 }
 0x405   :  { %v1063_v24 = vpack.c.bf16 %v3013_v29, %v3012_v0 }
 0x406   :  { %v1030_v31 = vpop.f32.mrf.mxu1 }
 0x407   :  { %v1062_v11 = vpack.c.bf16 %v1030_v31, %v1027_v54 }
 0x408   :  { %v3016_v30 = vpop.f32.mrf.mxu1 }
 0x409   :  { %3042 = vmatprep.mubr.bf16.mxu0 %v1062_v11 }
 0x40a   :  { %v1043_v47 = vpop.f32.mrf.mxu1  ;;  %3043 = vmatmul.mubr.bf16.gmra.mxu0 %v1063_v24 }
 0x40c   :  { %v3017_v52 = vpop.f32.mrf.mxu1 }
 0x40d   :  { %v1065_v26 = vpack.c.bf16 %v3017_v52, %v3016_v30 }
 0x40e   :  { %v1046_v50 = vpop.f32.mrf.mxu1 }
 0x40f   :  { %v1064_v62 = vpack.c.bf16 %v1046_v50, %v1043_v47  ;;  %3082 = vmatprep.subr.bf16.mxu0 %v1065_v26 }
 0x410   :  { %3083 = vmatpush3.bf16.msra.mxu0 %v1065_v26  ;;  %v3921_v18 = vpop.f32.mrf.mxu1 }
 0x411   :  { %3046 = vmatprep.mubr.bf16.mxu0 %v1064_v62  ;;  %3084 = vmatprep.subr.bf16.mxu0 %v1064_v62 }
 0x412   :  { %3047 = vmatmul.mubr.bf16.gmra.mxu0 %v1065_v26  ;;  %v3923_v42 = vpop.f32.mrf.mxu1 }
 0x413   :  { %3098 = vmatprep.mubr.bf16.mxu0 %v3906_v28  ;;  %4276 = vst [vmem:[#allocation24_spill] sm:$0xff] %v3923_v42 }
 0x414   :  { %3085 = vmatpush3.bf16.msra.mxu0 %v1064_v62  ;;  %v3925_v23 = vpop.f32.mrf.mxu1 }
 0x415   :  { %3086 = vmatprep.subr.bf16.mxu0 %v1063_v24 }
 0x416   :  { %v3931_v8 = vpop.f32.mrf.mxu1 }
 0x418   :  { %3087 = vmatpush3.bf16.msra.mxu0 %v1063_v24  ;;  %v3072_v32 = vpop.f32.mrf.mxu1 }
 0x419   :  { %3088 = vmatprep.subr.bf16.mxu0 %v1062_v11 }
 0x41c   :  { %3089 = vmatpush3.bf16.msra.mxu0 %v1062_v11 }
 0x41d   :  { %3090 = vmatprep.subr.bf16.mxu0 %v1061_v55 }
 0x420   :  { %3091 = vmatpush3.bf16.msra.mxu0 %v1061_v55 }
 0x421   :  { %3092 = vmatprep.subr.bf16.mxu0 %v1060_v56 }
 0x424   :  { %3093 = vmatpush3.bf16.msra.mxu0 %v1060_v56 }
 0x425   :  { %3094 = vmatprep.subr.bf16.mxu0 %v1059_v58 }
 0x428   :  { %3095 = vmatpush3.bf16.msra.mxu0 %v1059_v58 }
 0x429   :  { %3096 = vmatprep.subr.bf16.mxu0 %v1058_v5 }
 0x42c   :  { %3097 = vmatpush3.bf16.msra.mxu0 %v1058_v5 }
 0x42f   :  { %3099 = vmatmul.mubr.bf16.vlgmr.msra.gmra.mxu0 %v3909_v38 }
 0x430   :  { %3102 = vmatprep.mubr.bf16.mxu0 %v3912_v45 }
 0x437   :  { %3103 = vmatmul.mubr.bf16.gmra.mxu0 %v3703_v36  ;;  %v3384_v36 = vld [vmem:[#allocation8 + $0x98] sm:$0xff]  }
 0x438   :  { %3106 = vmatprep.mubr.bf16.mxu0 %v3705_v37  ;;  %3122 = vmatprep.subr.bf16.mxu1 %v3384_v36  ;;  %v3385_v37 = vld [vmem:[#allocation8 + $0x90] sm:$0xff]  }
 0x439   :  { %3123 = vmatpush3.bf16.msra.mxu1 %v3384_v36 }
 0x43a   :  { %3124 = vmatprep.subr.bf16.mxu1 %v3385_v37 }
 0x43d   :  { %3125 = vmatpush3.bf16.msra.mxu1 %v3385_v37 }
 0x43f   :  { %3107 = vmatmul.mubr.bf16.gmra.mxu0 %v3709_v40  ;;  %v3386_v40 = vld [vmem:[#allocation8 + $0x88] sm:$0xff]  }
 0x440   :  { %3110 = vmatprep.mubr.bf16.mxu0 %v3711_v41  ;;  %3126 = vmatprep.subr.bf16.mxu1 %v3386_v40  ;;  %v3387_v41 = vld [vmem:[#allocation8 + $0x80] sm:$0xff]  }
 0x441   :  { %3127 = vmatpush3.bf16.msra.mxu1 %v3386_v40 }
 0x442   :  { %3128 = vmatprep.subr.bf16.mxu1 %v3387_v41 }
 0x445   :  { %3129 = vmatpush3.bf16.msra.mxu1 %v3387_v41 }
 0x447   :  { %3111 = vmatmul.mubr.bf16.gmra.mxu0 %v4272_v22 }
 0x448   :  { %3162 = vmatprep.mubr.bf16.mxu0 %v3906_v28 }
 0x4ba   :  { %v3927_v61 = vpop.f32.mrf.mxu0 }
 0x4bc   :  { %v3929_v20 = vpop.f32.mrf.mxu0 }
 0x4bd   :  { %4277 = vst [vmem:[#allocation25_spill] sm:$0xff] %v3929_v20 }
 0x4be   :  { %v3933_v10 = vpop.f32.mrf.mxu0 }
 0x4c0   :  { %v3935_v6 = vpop.f32.mrf.mxu0 }
 0x4c2   :  { %v3040_v33 = vpop.f32.mrf.mxu0 }
 0x4c3   :  { %v3937_v22 = vadd.f32 %v3072_v32, %v3040_v33 }
 0x4c4   :  { %v3939_v4 = vpop.f32.mrf.mxu0 }
 0x4c6   :  { %v3941_v12 = vpop.f32.mrf.mxu0 }
 0x4c8   :  { %v3943_v16 = vpop.f32.mrf.mxu0 }
 0x4ca   :  { %v3945_v21 = vpop.f32.mrf.mxu0 }
 0x4cc   :  { %v3947_v15 = vpop.f32.mrf.mxu0 }
 0x4ce   :  { %v3949_v25 = vpop.f32.mrf.mxu0 }
 0x4d0   :  { %v3951_v5 = vpop.f32.mrf.mxu0 }
 0x4d2   :  { %v3953_v58 = vpop.f32.mrf.mxu0 }
 0x4d4   :  { %v3955_v59 = vpop.f32.mrf.mxu0 }
 0x4d6   :  { %v3957_v53 = vpop.f32.mrf.mxu0 }
 0x4d8   :  { %v3959_v19 = vpop.f32.mrf.mxu0 }
 0x4ef   :  { %v3100_v3 = vpop.f32.mrf.mxu0 }
 0x4f0   :  { %v1472_v29 = vmul.f32 2.0, %v3100_v3 }
 0x4f1   :  { %v1407_v56 = vpop.f32.mrf.mxu0 }
 0x4f2   :  { %v1470_v0 = vmul.f32 2.0, %v1407_v56  ;;  %v1488_v26 = vsub.f32 %v1472_v29, %v3884_v7 }
 0x4f3   :  { %v3101_v55 = vpop.f32.mrf.mxu0 }
 0x4f4   :  { %v1473_v54 = vmul.f32 2.0, %v3101_v55  ;;  %v1486_v47 = vsub.f32 %v1470_v0, %v3891_v35 }
 0x4f5   :  { %v1410_v31 = vpop.f32.mrf.mxu0 }
 0x4f6   :  { %v1471_v11 = vmul.f32 2.0, %v1410_v31  ;;  %v1489_v24 = vsub.f32 %v1473_v54, %v3879_v39 }
 0x4f7   :  { %v3104_v30 = vpop.f32.mrf.mxu0 }
 0x4f8   :  { %v1487_v52 = vsub.f32 %v1471_v11, %v3887_v46  ;;  %v1503_v34 = vpack.c.bf16 %v1489_v24, %v1488_v26  ;;  %v1476_v36 = vmul.f32 2.0, %v3104_v30 }
 0x4f9   :  { %v1423_v50 = vpop.f32.mrf.mxu0 }
 0x4fa   :  { %v1502_v62 = vpack.c.bf16 %v1487_v52, %v1486_v47  ;;  %v1474_v48 = vmul.f32 2.0, %v1423_v50  ;;  %v1492_v56 = vsub.f32 %v1476_v36, %v3861_v49 }
 0x4fb   :  { %v3105_v14 = vpop.f32.mrf.mxu0 }
 0x4fc   :  { %v1477_v44 = vmul.f32 2.0, %v3105_v14  ;;  %3130 = vmatprep.mubr.bf16.mxu1 %v1502_v62  ;;  %v1490_v33 = vsub.f32 %v1474_v48, %v3875_v13 }
 0x4fd   :  { %v1426_v37 = vpop.f32.mrf.mxu0  ;;  %3131 = vmatmul.mubr.bf16.vlgmr.msra.gmra.mxu1 %v1503_v34 }
 0x4fe   :  { %v1475_v40 = vmul.f32 2.0, %v1426_v37  ;;  %v1493_v41 = vsub.f32 %v1477_v44, %v3852_v27 }
 0x4ff   :  { %v3108_v32 = vpop.f32.mrf.mxu0 }
 0x500   :  { %v1491_v3 = vsub.f32 %v1475_v40, %v3867_v17  ;;  %v1505_v29 = vpack.c.bf16 %v1493_v41, %v1492_v56  ;;  %v1480_v24 = vmul.f32 2.0, %v3108_v32 }
 0x501   :  { %v1439_v55 = vpop.f32.mrf.mxu0 }
 0x502   :  { %v1504_v0 = vpack.c.bf16 %v1491_v3, %v1490_v33  ;;  %v1478_v31 = vmul.f32 2.0, %v1439_v55  ;;  %v1496_v34 = vsub.f32 %v1480_v24, %v3834_v1 }
 0x503   :  { %v3109_v54 = vpop.f32.mrf.mxu0 }
 0x504   :  { %v1481_v11 = vmul.f32 2.0, %v3109_v54  ;;  %3134 = vmatprep.mubr.bf16.mxu1 %v1504_v0  ;;  %v1494_v50 = vsub.f32 %v1478_v31, %v3847_v51  ;;  %v3977_v31 = vpop.f32.mrf.mxu1 }
 0x505   :  { %v1442_v30 = vpop.f32.mrf.mxu0  ;;  %3135 = vmatmul.mubr.bf16.gmra.mxu1 %v1505_v29 }
 0x506   :  { %v1479_v47 = vmul.f32 2.0, %v1442_v30  ;;  %v1497_v52 = vsub.f32 %v1481_v11, %v3824_v60  ;;  %v3979_v11 = vpop.f32.mrf.mxu1 }
 0x507   :  { %v3112_v26 = vpop.f32.mrf.mxu0 }
 0x508   :  { %v1495_v62 = vsub.f32 %v1479_v47, %v3837_v63  ;;  %v1507_v36 = vpack.c.bf16 %v1497_v52, %v1496_v34  ;;  %v1484_v41 = vmul.f32 2.0, %v3112_v26  ;;  %v3981_v24 = vpop.f32.mrf.mxu1 }
 0x509   :  { %v1455_v14 = vpop.f32.mrf.mxu0 }
 0x50a   :  { %v1506_v48 = vpack.c.bf16 %v1495_v62, %v1494_v50  ;;  %v1482_v37 = vmul.f32 2.0, %v1455_v14  ;;  %v1500_v0 = vsub.f32 %v1484_v41, %v3810_v43  ;;  %v3076_v30 = vpop.f32.mrf.mxu1  ;;  %v3396_v14 = vld [vmem:[#allocation10 + $0x78] sm:$0xff]  }
 0x50b   :  { %v3113_v44 = vpop.f32.mrf.mxu0  ;;  %3178 = vmatprep.subr.bf16.mxu1 %v3396_v14  ;;  %v1351_v39 = vadd.f32 %v3076_v30, %v3945_v21 }
 0x50c   :  { %v1485_v40 = vmul.f32 2.0, %v3113_v44  ;;  %3138 = vmatprep.mubr.bf16.mxu1 %v1506_v48  ;;  %v1498_v56 = vsub.f32 %v1482_v37, %v3815_v2  ;;  %v1342_v47 = vpop.f32.mrf.mxu1  ;;  %v3397_v48 = vld [vmem:[#allocation10 + $0x70] sm:$0xff]   ;;  %3179 = vmatpush3.bf16.msra.mxu1 %v3396_v14  ;;  %v3398_v37 = vld [vmem:[#allocation10 + $0x68] sm:$0xff]  }
 0x50d   :  { %v1458_v32 = vpop.f32.mrf.mxu0  ;;  %3139 = vmatmul.mubr.bf16.gmra.mxu1 %v1507_v36  ;;  %3180 = vmatprep.subr.bf16.mxu1 %v3397_v48  ;;  %v1343_v21 = vadd.f32 %v1342_v47, %v3947_v15 }
 0x50e   :  { %v1483_v33 = vmul.f32 2.0, %v1458_v32  ;;  %v1501_v3 = vsub.f32 %v1485_v40, %v3812_v57  ;;  %v3077_v52 = vpop.f32.mrf.mxu1  ;;  %v3399_v32 = vld [vmem:[#allocation10 + $0x60] sm:$0xff]  }
 0x510   :  { %v1499_v55 = vsub.f32 %v1483_v33, %v3817_v9  ;;  %v1509_v29 = vpack.c.bf16 %v1501_v3, %v1500_v0  ;;  %v1345_v26 = vpop.f32.mrf.mxu1  ;;  %3181 = vmatpush3.bf16.msra.mxu1 %v3397_v48 }
 0x511   :  { %3182 = vmatprep.subr.bf16.mxu1 %v3398_v37 }
 0x512   :  { %v1508_v54 = vpack.c.bf16 %v1499_v55, %v1498_v56  ;;  %v3080_v50 = vpop.f32.mrf.mxu1  ;;  %v3400_v56 = vld [vmem:[#allocation10 + $0x58] sm:$0xff]  }
 0x513   :  { %v1367_v38 = vadd.f32 %v3080_v50, %v3953_v58 }
 0x514   :  { %3142 = vmatprep.mubr.bf16.mxu1 %v1508_v54  ;;  %v1358_v62 = vpop.f32.mrf.mxu1  ;;  %3183 = vmatpush3.bf16.msra.mxu1 %v3398_v37  ;;  %v3401_v54 = vld [vmem:[#allocation10 + $0x50] sm:$0xff]  }
 0x515   :  { %3143 = vmatmul.mubr.bf16.gmra.mxu1 %v1509_v29  ;;  %3184 = vmatprep.subr.bf16.mxu1 %v3399_v32  ;;  %v1359_v37 = vadd.f32 %v1358_v62, %v3955_v59 }
 0x516   :  { %v3081_v34 = vpop.f32.mrf.mxu1 }
 0x518   :  { %v1361_v44 = vpop.f32.mrf.mxu1  ;;  %3185 = vmatpush3.bf16.msra.mxu1 %v3399_v32  ;;  %v1370_v32 = vadd.f32 %v3081_v34, %v3957_v53  ;;  %v4282_v34 = vld [vmem:[#allocation24_spill] sm:$0xff] }
 0x519   :  { %3186 = vmatprep.subr.bf16.mxu1 %v3400_v56  ;;  %v1362_v20 = vadd.f32 %v1361_v44, %v3959_v19  ;;  %v1327_v19 = vadd.f32 %v3977_v31, %v3939_v4  ;;  %v1319_v31 = vadd.f32 %v3921_v18, %v3927_v61 }
 0x51c   :  { %3187 = vmatpush3.bf16.msra.mxu1 %v3400_v56 }
 0x51d   :  { %3188 = vmatprep.subr.bf16.mxu1 %v3401_v54 }
 0x520   :  { %3189 = vmatpush3.bf16.msra.mxu1 %v3401_v54 }
 0x5bd   :  { %v3983_v36 = vpop.f32.mrf.mxu1 }
 0x5be   :  { %v1674_v18 = vadd.f32 %v3983_v36, %v1319_v31  ;;  %v3392_v31 = vld [vmem:[#allocation10 + $0x18] sm:$0xff]  }
 0x5bf   :  { %v3985_v40 = vpop.f32.mrf.mxu1 }
 0x5c0   :  { %4278 = vst [vmem:[#allocation26_spill] sm:$0xff] %v3985_v40  ;;  %v1354_v40 = vadd.f32 %v3077_v52, %v3949_v25 }
 0x5c1   :  { %v3987_v41 = vpop.f32.mrf.mxu1 }
 0x5c3   :  { %v3989_v33 = vpop.f32.mrf.mxu1 }
 0x5c4   :  { %4279 = vst [vmem:[#allocation27_spill] sm:$0xff] %v3989_v33 }
 0x5c5   :  { %v3136_v3 = vpop.f32.mrf.mxu1 }
 0x5c7   :  { %v3991_v55 = vpop.f32.mrf.mxu1 }
 0x5c9   :  { %v3137_v0 = vpop.f32.mrf.mxu1 }
 0x5cb   :  { %v1628_v29 = vpop.f32.mrf.mxu1 }
 0x5cd   :  { %v3140_v14 = vpop.f32.mrf.mxu1 }
 0x5ce   :  { %v1682_v50 = vadd.f32 %v3140_v14, %v1351_v39 }
 0x5cf   :  { %v1641_v28 = vpop.f32.mrf.mxu1 }
 0x5d1   :  { %v3141_v48 = vpop.f32.mrf.mxu1 }
 0x5d2   :  { %v1683_v56 = vadd.f32 %v3141_v48, %v1354_v40  ;;  %v4283_v40 = vld [vmem:[#allocation18_spill] sm:$0xff] }
 0x5d3   :  { %v1644_v45 = vpop.f32.mrf.mxu1 }
 0x5d4   :  { %v4011_v59 = vadd.f32 %v1683_v56, %v3824_v60 }
 0x5d5   :  { %v3144_v35 = vpop.f32.mrf.mxu1 }
 0x5d6   :  { %v1686_v46 = vadd.f32 %v3144_v35, %v1367_v38  ;;  %v1346_v35 = vadd.f32 %v1345_v26, %v3951_v5 }
 0x5d7   :  { %v1657_v7 = vpop.f32.mrf.mxu1 }
 0x5d8   :  { %v1684_v33 = vadd.f32 %v1657_v7, %v1359_v37  ;;  %v4000_v54 = vadd.f32 %v1686_v46, %v3810_v43  ;;  %v1681_v53 = vadd.f32 %v1644_v45, %v1346_v35  ;;  %v4287_v37 = vld [vmem:[#allocation20_spill] sm:$0xff] }
 0x5d9   :  { %v3145_v42 = vpop.f32.mrf.mxu1 }
 0x5da   :  { %v1687_v58 = vadd.f32 %v3145_v42, %v1370_v32  ;;  %v4004_v38 = vadd.f32 %v1684_v33, %v3815_v2  ;;  %v1718_v43 = vmax.f32 %v4000_v54, 0.0  ;;  %v1338_v2 = vadd.f32 %v3979_v11, %v3941_v12  ;;  %v4284_v33 = vld [vmem:[#allocation27_spill] sm:$0xff] }
 0x5db   :  { %v1660_v13 = vpop.f32.mrf.mxu1  ;;  %v4033_v15 = vadd.f32 %v1681_v53, %v3837_v63  ;;  %v1678_v12 = vadd.f32 %v3136_v3, %v3937_v22 }
 0x5dc   :  { %v4007_v25 = vadd.f32 %v1687_v58, %v3812_v57  ;;  %v1685_v7 = vadd.f32 %v1660_v13, %v1362_v20  ;;  %v4021_v57 = vadd.f32 %v1682_v50, %v3834_v1  ;;  %v1680_v13 = vadd.f32 %v1641_v28, %v1343_v21  ;;  %v4288_v50 = vld [vmem:[#allocation21_spill] sm:$0xff] }
 0x5dd   :  { %v1716_v42 = vmax.f32 %v4004_v38, 0.0  ;;  %v1679_v20 = vadd.f32 %v3137_v0, %v1338_v2  ;;  %v1330_v28 = vadd.f32 %v3981_v24, %v3943_v16  ;;  %v1713_v47 = vmax.f32 %v4033_v15, 0.0  ;;  %v4286_v0 = vld [vmem:[#allocation26_spill] sm:$0xff] }
 0x5de   :  { %v1719_v39 = vmax.f32 %v4007_v25, 0.0  ;;  %v4016_v46 = vadd.f32 %v1685_v7, %v3817_v9  ;;  %v1715_v9 = vmax.f32 %v4011_v59, 0.0  ;;  %v1714_v5 = vmax.f32 %v4021_v57, 0.0 }
 0x5df   :  { %v4048_v63 = vadd.f32 %v1680_v13, %v3847_v51  ;;  %v4054_v11 = vadd.f32 %v1679_v20, %v3852_v27  ;;  %v1677_v30 = vadd.f32 %v1628_v29, %v1330_v28  ;;  %v1322_v51 = vadd.f32 %v3925_v23, %v3933_v10  ;;  %v4280_v10 = vld [vmem:[#allocation17_spill] sm:$0xff]  ;;  %v3388_v13 = vld [vmem:[#allocation10 + $0x38] sm:$0xff]   ;;  %v3389_v20 = vld [vmem:[#allocation10 + $0x30] sm:$0xff]  }
 0x5e0   :  { %v1717_v60 = vmax.f32 %v4016_v46, 0.0  ;;  %v4029_v45 = vpack.c.bf16 %v1719_v39, %v1718_v43  ;;  %v4061_v22 = vpack.c.bf16 %v1715_v9, %v1714_v5  ;;  %v4067_v16 = vadd.f32 %v1678_v12, %v3861_v49  ;;  %v4289_v28 = vld [vmem:[#allocation22_spill] sm:$0xff]  ;;  %v4290_v12 = vld [vmem:[#allocation23_spill] sm:$0xff] }
 0x5e1   :  { %v1676_v27 = vadd.f32 %v3991_v55, %v1327_v19  ;;  %v1712_v4 = vmax.f32 %v4048_v63, 0.0  ;;  %v1675_v24 = vadd.f32 %v3987_v41, %v1322_v51  ;;  %v1711_v52 = vmax.f32 %v4054_v11, 0.0  ;;  %v3390_v19 = vld [vmem:[#allocation10 + $0x28] sm:$0xff]   ;;  %v4135_v51 = vld [vmem:[#allocation2 + $0x18] sm:$0xff]  }
 0x5e2   :  { %3146 = vmatprep.subr.bf16.mxu0 %v4029_v45  ;;  %v4040_v1 = vpack.c.bf16 %v1717_v60, %v1716_v42  ;;  %v4077_v26 = vadd.f32 %v1677_v30, %v3867_v17  ;;  %v1314_v23 = vadd.f32 %v3931_v8, %v3935_v6  ;;  %v1710_v61 = vmax.f32 %v4067_v16, 0.0  ;;  %v4281_v17 = vld [vmem:[#allocation25_spill] sm:$0xff]  ;;  %v4285_v6 = vld [vmem:[#allocation19_spill] sm:$0xff]  ;;  %v3391_v30 = vld [vmem:[#allocation10 + $0x20] sm:$0xff]  }
 0x5e3   :  { %3147 = vmatpush3.bf16.msra.mxu0 %v4029_v45  ;;  %v4083_v49 = vpack.c.bf16 %v1713_v47, %v1712_v4  ;;  %v4091_v62 = vadd.f32 %v1676_v27, %v4280_v10  ;;  %v1311_v44 = vadd.f32 %v4282_v34, %v4281_v17  ;;  %v4097_v41 = vadd.f32 %v1675_v24, %v4283_v40  ;;  %v4138_v27 = vld [vmem:[#allocation2 + $0x20] sm:$0xff]   ;;  %v3393_v24 = vld [vmem:[#allocation10 + $0x10] sm:$0xff]   ;;  %v3394_v10 = vld [vmem:[#allocation10 + $0x8] sm:$0xff]  }
 0x5e4   :  { %3148 = vmatprep.subr.bf16.mxu0 %v4040_v1  ;;  %v1673_v3 = vadd.f32 %v4284_v33, %v1314_v23  ;;  %v1709_v55 = vmax.f32 %v4077_v26, 0.0  ;;  %v1723_v8 = vpack.c.bf16 %v1711_v52, %v1710_v61  ;;  %v4107_v36 = vadd.f32 %v1674_v18, %v4285_v6  ;;  %v4141_v23 = vld [vmem:[#allocation2 + $0x28] sm:$0xff]   ;;  %v4144_v18 = vld [vmem:[#allocation2 + $0x30] sm:$0xff]   ;;  %v3395_v17 = vld [vmem:[#allocation10] sm:$0xff]  }
 0x5e5   :  { %v1672_v29 = vadd.f32 %v4286_v0, %v1311_v44  ;;  %v1708_v14 = vmax.f32 %v4091_v62, 0.0  ;;  %v1707_v48 = vmax.f32 %v4097_v41, 0.0  ;;  %v4147_v34 = vld [vmem:[#allocation2 + $0x38] sm:$0xff]   ;;  %v3402_v44 = vld [vmem:[#allocation10 + $0x48] sm:$0xff]   ;;  %v3403_v40 = vld [vmem:[#allocation10 + $0x40] sm:$0xff]  }
 0x5e6   :  { %v4113_v32 = vadd.f32 %v1673_v3, %v4287_v37  ;;  %v1706_v58 = vmax.f32 %v4107_v36, 0.0  ;;  %3190 = vmatprep.subr.bf16.mxu1 %v3402_v44 }
 0x5e7   :  { %3149 = vmatpush3.bf16.msra.mxu0 %v4040_v1  ;;  %v1722_v56 = vpack.c.bf16 %v1709_v55, %v1708_v14  ;;  %v4121_v35 = vadd.f32 %v1672_v29, %v4288_v50  ;;  %3191 = vmatpush3.bf16.msra.mxu1 %v3402_v44 }
 0x5e8   :  { %3150 = vmatprep.subr.bf16.mxu0 %v4061_v22  ;;  %v1705_v7 = vmax.f32 %v4113_v32, 0.0  ;;  %v1721_v21 = vpack.c.bf16 %v1707_v48, %v1706_v58  ;;  %3192 = vmatprep.subr.bf16.mxu1 %v3403_v40 }
 0x5e9   :  { %v1704_v53 = vmax.f32 %v4121_v35, 0.0 }
 0x5eb   :  { %3151 = vmatpush3.bf16.msra.mxu0 %v4061_v22  ;;  %v1720_v2 = vpack.c.bf16 %v1705_v7, %v1704_v53  ;;  %3193 = vmatpush3.bf16.msra.mxu1 %v3403_v40  ;;  %v4291_v40 = vld [vmem:[#allocation16_spill] sm:$0xff] }
 0x5ec   :  { %3152 = vmatprep.subr.bf16.mxu0 %v4083_v49 }
 0x5ef   :  { %3153 = vmatpush3.bf16.msra.mxu0 %v4083_v49 }
 0x5f0   :  { %3154 = vmatprep.subr.bf16.mxu0 %v1723_v8 }
 0x5f3   :  { %3155 = vmatpush3.bf16.msra.mxu0 %v1723_v8 }
 0x5f4   :  { %3156 = vmatprep.subr.bf16.mxu0 %v1722_v56 }
 0x5f7   :  { %3157 = vmatpush3.bf16.msra.mxu0 %v1722_v56 }
 0x5f8   :  { %3158 = vmatprep.subr.bf16.mxu0 %v1721_v21 }
 0x5fb   :  { %3159 = vmatpush3.bf16.msra.mxu0 %v1721_v21 }
 0x5fc   :  { %3160 = vmatprep.subr.bf16.mxu0 %v1720_v2 }
 0x5ff   :  { %3161 = vmatpush3.bf16.msra.mxu0 %v1720_v2 }
 0x600   :  { %3210 = vmatprep.subr.bf16.mxu0 %v3388_v13 }
 0x602   :  { %3163 = vmatmul.mubr.bf16.vlgmr.msra.gmra.mxu0 %v4289_v28 }
 0x603   :  { %3211 = vmatpush3.bf16.msra.mxu0 %v3388_v13  ;;  %3166 = vmatprep.mubr.bf16.mxu0 %v4290_v12 }
 0x604   :  { %3212 = vmatprep.subr.bf16.mxu0 %v3389_v20 }
 0x607   :  { %3213 = vmatpush3.bf16.msra.mxu0 %v3389_v20 }
 0x608   :  { %3214 = vmatprep.subr.bf16.mxu0 %v3390_v19 }
 0x60a   :  { %3167 = vmatmul.mubr.bf16.gmra.mxu0 %v4135_v51 }
 0x60b   :  { %3215 = vmatpush3.bf16.msra.mxu0 %v3390_v19  ;;  %3170 = vmatprep.mubr.bf16.mxu0 %v4138_v27 }
 0x60c   :  { %3216 = vmatprep.subr.bf16.mxu0 %v3391_v30 }
 0x60f   :  { %3217 = vmatpush3.bf16.msra.mxu0 %v3391_v30 }
 0x610   :  { %3218 = vmatprep.subr.bf16.mxu0 %v3392_v31 }
 0x612   :  { %3171 = vmatmul.mubr.bf16.gmra.mxu0 %v4141_v23 }
 0x613   :  { %3219 = vmatpush3.bf16.msra.mxu0 %v3392_v31  ;;  %3174 = vmatprep.mubr.bf16.mxu0 %v4144_v18 }
 0x614   :  { %3220 = vmatprep.subr.bf16.mxu0 %v3393_v24 }
 0x617   :  { %3221 = vmatpush3.bf16.msra.mxu0 %v3393_v24 }
 0x618   :  { %3222 = vmatprep.subr.bf16.mxu0 %v3394_v10 }
 0x61a   :  { %3175 = vmatmul.mubr.bf16.gmra.mxu0 %v4147_v34 }
 0x61b   :  { %3223 = vmatpush3.bf16.msra.mxu0 %v3394_v10  ;;  %3226 = vmatprep.mubr.bf16.mxu0 %v1720_v2 }
 0x61c   :  { %3224 = vmatprep.subr.bf16.mxu0 %v3395_v17 }
 0x61f   :  { %3225 = vmatpush3.bf16.msra.mxu0 %v3395_v17 }
 0x622   :  { %3227 = vmatmul.mubr.bf16.vlgmr.msra.gmra.mxu0 %v1721_v21 }
 0x623   :  { %3230 = vmatprep.mubr.bf16.mxu0 %v1722_v56 }
 0x62a   :  { %3231 = vmatmul.mubr.bf16.gmra.mxu0 %v1723_v8 }
 0x62b   :  { %3234 = vmatprep.mubr.bf16.mxu0 %v4083_v49 }
 0x632   :  { %3235 = vmatmul.mubr.bf16.gmra.mxu0 %v4061_v22 }
 0x633   :  { %3238 = vmatprep.mubr.bf16.mxu0 %v4040_v1 }
 0x63a   :  { %3239 = vmatmul.mubr.bf16.gmra.mxu0 %v4029_v45 }
 0x6c2   :  { %v3164_v33 = vpop.f32.mrf.mxu0 }
 0x6c4   :  { %v1778_v3 = vpop.f32.mrf.mxu0 }
 0x6c6   :  { %v3165_v6 = vpop.f32.mrf.mxu0 }
 0x6c7   :  { %v1842_v8 = vpack.c.bf16 %v3165_v6, %v3164_v33  ;;  %v3404_v33 = vld [vmem:[#allocation10 + $0xb8] sm:$0xff]  }
 0x6c8   :  { %v1781_v0 = vpop.f32.mrf.mxu0  ;;  %3274 = vmatprep.subr.bf16.mxu0 %v3404_v33 }
 0x6c9   :  { %v1841_v29 = vpack.c.bf16 %v1781_v0, %v1778_v3  ;;  %v3405_v3 = vld [vmem:[#allocation10 + $0xb0] sm:$0xff]   ;;  %3275 = vmatpush3.bf16.msra.mxu0 %v3404_v33 }
 0x6ca   :  { %v3168_v37 = vpop.f32.mrf.mxu0  ;;  %3276 = vmatprep.subr.bf16.mxu0 %v3405_v3 }
 0x6cb   :  { %3194 = vmatprep.mubr.bf16.mxu1 %v1841_v29 }
 0x6cc   :  { %v1794_v49 = vpop.f32.mrf.mxu0  ;;  %3195 = vmatmul.mubr.bf16.vlgmr.msra.gmra.mxu1 %v1842_v8 }
 0x6cd   :  { %3277 = vmatpush3.bf16.msra.mxu0 %v3405_v3 }
 0x6ce   :  { %v3169_v22 = vpop.f32.mrf.mxu0 }
 0x6cf   :  { %v1844_v45 = vpack.c.bf16 %v3169_v22, %v3168_v37 }
 0x6d0   :  { %v1797_v1 = vpop.f32.mrf.mxu0 }
 0x6d1   :  { %v1843_v56 = vpack.c.bf16 %v1797_v1, %v1794_v49 }
 0x6d2   :  { %v3172_v50 = vpop.f32.mrf.mxu0 }
 0x6d3   :  { %3198 = vmatprep.mubr.bf16.mxu1 %v1843_v56 }
 0x6d4   :  { %v1810_v21 = vpop.f32.mrf.mxu0  ;;  %3199 = vmatmul.mubr.bf16.gmra.mxu1 %v1844_v45 }
 0x6d6   :  { %v3173_v2 = vpop.f32.mrf.mxu0 }
 0x6d7   :  { %v1846_v19 = vpack.c.bf16 %v3173_v2, %v3172_v50 }
 0x6d8   :  { %v1813_v13 = vpop.f32.mrf.mxu0 }
 0x6d9   :  { %v1845_v20 = vpack.c.bf16 %v1813_v13, %v1810_v21 }
 0x6da   :  { %v3176_v30 = vpop.f32.mrf.mxu0 }
 0x6db   :  { %3202 = vmatprep.mubr.bf16.mxu1 %v1845_v20 }
 0x6dc   :  { %v1826_v31 = vpop.f32.mrf.mxu0  ;;  %3203 = vmatmul.mubr.bf16.gmra.mxu1 %v1846_v19 }
 0x6de   :  { %v3177_v24 = vpop.f32.mrf.mxu0 }
 0x6df   :  { %v1848_v10 = vpack.c.bf16 %v3177_v24, %v3176_v30 }
 0x6e0   :  { %v1829_v17 = vpop.f32.mrf.mxu0 }
 0x6e1   :  { %v1847_v44 = vpack.c.bf16 %v1829_v17, %v1826_v31  ;;  %3242 = vmatprep.subr.bf16.mxu1 %v1848_v10 }
 0x6e2   :  { %3243 = vmatpush3.bf16.msra.mxu1 %v1848_v10 }
 0x6e3   :  { %3206 = vmatprep.mubr.bf16.mxu1 %v1847_v44  ;;  %3244 = vmatprep.subr.bf16.mxu1 %v1847_v44 }
 0x6e4   :  { %3207 = vmatmul.mubr.bf16.gmra.mxu1 %v1848_v10 }
 0x6e5   :  { %3258 = vmatprep.mubr.bf16.mxu1 %v4291_v40 }
 0x6e6   :  { %3245 = vmatpush3.bf16.msra.mxu1 %v1847_v44 }
 0x6e7   :  { %3246 = vmatprep.subr.bf16.mxu1 %v1846_v19 }
 0x6ea   :  { %3247 = vmatpush3.bf16.msra.mxu1 %v1846_v19 }
 0x6eb   :  { %3248 = vmatprep.subr.bf16.mxu1 %v1845_v20 }
 0x6ee   :  { %3249 = vmatpush3.bf16.msra.mxu1 %v1845_v20 }
 0x6ef   :  { %3250 = vmatprep.subr.bf16.mxu1 %v1844_v45 }
 0x6f2   :  { %3251 = vmatpush3.bf16.msra.mxu1 %v1844_v45 }
 0x6f3   :  { %3252 = vmatprep.subr.bf16.mxu1 %v1843_v56 }
 0x6f6   :  { %3253 = vmatpush3.bf16.msra.mxu1 %v1843_v56 }
 0x6f7   :  { %3254 = vmatprep.subr.bf16.mxu1 %v1842_v8 }
 0x6fa   :  { %3255 = vmatpush3.bf16.msra.mxu1 %v1842_v8 }
 0x6fb   :  { %3256 = vmatprep.subr.bf16.mxu1 %v1841_v29 }
 0x6fe   :  { %3257 = vmatpush3.bf16.msra.mxu1 %v1841_v29 }
 0x6ff   :  { %3306 = vmatprep.subr.bf16.mxu1 %v3404_v33 }
 0x701   :  { %3259 = vmatmul.mubr.bf16.vlgmr.msra.gmra.mxu1 %v4289_v28  ;;  %v3406_v28 = vld [vmem:[#allocation10 + $0xa8] sm:$0xff]  }
 0x702   :  { %3262 = vmatprep.mubr.bf16.mxu1 %v4290_v12  ;;  %3314 = vmatpush3.bf16.msra.mxu1 %v3404_v33  ;;  %v3407_v12 = vld [vmem:[#allocation10 + $0xa0] sm:$0xff]  }
 0x703   :  { %3307 = vmatprep.subr.bf16.mxu1 %v3405_v3  ;;  %3278 = vmatprep.subr.bf16.mxu0 %v3406_v28 }
 0x704   :  { %3279 = vmatpush3.bf16.msra.mxu0 %v3406_v28 }
 0x705   :  { %3280 = vmatprep.subr.bf16.mxu0 %v3407_v12 }
 0x706   :  { %3315 = vmatpush3.bf16.msra.mxu1 %v3405_v3 }
 0x707   :  { %3308 = vmatprep.subr.bf16.mxu1 %v3406_v28 }
 0x708   :  { %3281 = vmatpush3.bf16.msra.mxu0 %v3407_v12 }
 0x709   :  { %3263 = vmatmul.mubr.bf16.gmra.mxu1 %v4135_v51  ;;  %v3408_v51 = vld [vmem:[#allocation10 + $0x98] sm:$0xff]  }
 0x70a   :  { %3266 = vmatprep.mubr.bf16.mxu1 %v4138_v27  ;;  %3316 = vmatpush3.bf16.msra.mxu1 %v3406_v28  ;;  %v3409_v27 = vld [vmem:[#allocation10 + $0x90] sm:$0xff]  }
 0x70b   :  { %3309 = vmatprep.subr.bf16.mxu1 %v3407_v12  ;;  %3282 = vmatprep.subr.bf16.mxu0 %v3408_v51 }
 0x70c   :  { %3283 = vmatpush3.bf16.msra.mxu0 %v3408_v51 }
 0x70d   :  { %3284 = vmatprep.subr.bf16.mxu0 %v3409_v27 }
 0x70e   :  { %3317 = vmatpush3.bf16.msra.mxu1 %v3407_v12 }
 0x70f   :  { %3310 = vmatprep.subr.bf16.mxu1 %v3408_v51 }
 0x710   :  { %3285 = vmatpush3.bf16.msra.mxu0 %v3409_v27 }
 0x711   :  { %3267 = vmatmul.mubr.bf16.gmra.mxu1 %v4141_v23  ;;  %v3410_v23 = vld [vmem:[#allocation10 + $0x88] sm:$0xff]  }
 0x712   :  { %3270 = vmatprep.mubr.bf16.mxu1 %v4144_v18  ;;  %3318 = vmatpush3.bf16.msra.mxu1 %v3408_v51  ;;  %v3411_v18 = vld [vmem:[#allocation10 + $0x80] sm:$0xff]  }
 0x713   :  { %3311 = vmatprep.subr.bf16.mxu1 %v3409_v27  ;;  %3286 = vmatprep.subr.bf16.mxu0 %v3410_v23 }
 0x714   :  { %3287 = vmatpush3.bf16.msra.mxu0 %v3410_v23 }
 0x715   :  { %3288 = vmatprep.subr.bf16.mxu0 %v3411_v18 }
 0x716   :  { %3319 = vmatpush3.bf16.msra.mxu1 %v3409_v27 }
 0x717   :  { %3312 = vmatprep.subr.bf16.mxu1 %v3410_v23 }
 0x718   :  { %3289 = vmatpush3.bf16.msra.mxu0 %v3411_v18 }
 0x719   :  { %3271 = vmatmul.mubr.bf16.gmra.mxu1 %v4147_v34 }
 0x71a   :  { %3320 = vmatpush3.bf16.msra.mxu1 %v3410_v23 }
 0x71b   :  { %3313 = vmatprep.subr.bf16.mxu1 %v3411_v18 }
 0x71e   :  { %3321 = vmatpush3.bf16.msra.mxu1 %v3411_v18 }
 0x78c   :  { %v4162_v34 = vpop.f32.mrf.mxu1 }
 0x78e   :  { %v4164_v6 = vpop.f32.mrf.mxu1 }
 0x790   :  { %v4166_v0 = vpop.f32.mrf.mxu1 }
 0x792   :  { %v4168_v29 = vpop.f32.mrf.mxu1 }
 0x794   :  { %v4170_v8 = vpop.f32.mrf.mxu1 }
 0x796   :  { %v4172_v37 = vpop.f32.mrf.mxu1 }
 0x798   :  { %v4174_v49 = vpop.f32.mrf.mxu1 }
 0x79a   :  { %v4176_v22 = vpop.f32.mrf.mxu1 }
 0x79c   :  { %v4178_v1 = vpop.f32.mrf.mxu1 }
 0x79e   :  { %v4180_v56 = vpop.f32.mrf.mxu1 }
 0x7a0   :  { %v4182_v45 = vpop.f32.mrf.mxu1 }
 0x7a2   :  { %v4184_v50 = vpop.f32.mrf.mxu1 }
 0x7a4   :  { %v4186_v21 = vpop.f32.mrf.mxu1 }
 0x7a6   :  { %v4188_v2 = vpop.f32.mrf.mxu1 }
 0x7a8   :  { %v4190_v13 = vpop.f32.mrf.mxu1 }
 0x7aa   :  { %v4192_v20 = vpop.f32.mrf.mxu1 }
 0x7c1   :  { %v3260_v19 = vpop.f32.mrf.mxu1 }
 0x7c2   :  { %v2255_v17 = vmul.f32 2.0, %v3260_v19 }
 0x7c3   :  { %v2190_v30 = vpop.f32.mrf.mxu1 }
 0x7c4   :  { %v2253_v24 = vmul.f32 2.0, %v2190_v30  ;;  %v2271_v51 = vsub.f32 %v2255_v17, %v1706_v58 }
 0x7c5   :  { %v3261_v31 = vpop.f32.mrf.mxu1 }
 0x7c6   :  { %v2256_v10 = vmul.f32 2.0, %v3261_v31  ;;  %v2269_v28 = vsub.f32 %v2253_v24, %v1704_v53 }
 0x7c7   :  { %v2193_v44 = vpop.f32.mrf.mxu1 }
 0x7c8   :  { %v2254_v40 = vmul.f32 2.0, %v2193_v44  ;;  %v2272_v33 = vsub.f32 %v2256_v10, %v1707_v48 }
 0x7c9   :  { %v3264_v3 = vpop.f32.mrf.mxu1 }
 0x7ca   :  { %v2270_v12 = vsub.f32 %v2254_v40, %v1705_v7  ;;  %v2286_v18 = vpack.c.bf16 %v2272_v33, %v2271_v51  ;;  %v2259_v44 = vmul.f32 2.0, %v3264_v3 }
 0x7cb   :  { %v2206_v27 = vpop.f32.mrf.mxu1 }
 0x7cc   :  { %v2285_v23 = vpack.c.bf16 %v2270_v12, %v2269_v28  ;;  %v2257_v19 = vmul.f32 2.0, %v2206_v27  ;;  %v2275_v58 = vsub.f32 %v2259_v44, %v1710_v61 }
 0x7cd   :  { %v3265_v30 = vpop.f32.mrf.mxu1 }
 0x7ce   :  { %v2260_v31 = vmul.f32 2.0, %v3265_v30  ;;  %3290 = vmatprep.mubr.bf16.mxu0 %v2285_v23  ;;  %v2273_v32 = vsub.f32 %v2257_v19, %v1708_v14  ;;  %v3228_v30 = vpop.f32.mrf.mxu0 }
 0x7cf   :  { %v2209_v41 = vpop.f32.mrf.mxu1  ;;  %3291 = vmatmul.mubr.bf16.vlgmr.msra.gmra.mxu0 %v2286_v18 }
 0x7d0   :  { %v2258_v48 = vmul.f32 2.0, %v2209_v41  ;;  %v2276_v35 = vsub.f32 %v2260_v31, %v1711_v52  ;;  %v2093_v19 = vpop.f32.mrf.mxu0 }
 0x7d1   :  { %v3268_v53 = vpop.f32.mrf.mxu1 }
 0x7d2   :  { %v2274_v36 = vsub.f32 %v2258_v48, %v1709_v55  ;;  %v2288_v10 = vpack.c.bf16 %v2276_v35, %v2275_v58  ;;  %v2263_v3 = vmul.f32 2.0, %v3268_v53  ;;  %v3229_v31 = vpop.f32.mrf.mxu0  ;;  %v2094_v58 = vadd.f32 %v2093_v19, %v4164_v6 }
 0x7d3   :  { %v2222_v7 = vpop.f32.mrf.mxu1 }
 0x7d4   :  { %v2287_v24 = vpack.c.bf16 %v2274_v36, %v2273_v32  ;;  %v2261_v40 = vmul.f32 2.0, %v2222_v7  ;;  %v2279_v61 = vsub.f32 %v2263_v3, %v1714_v5  ;;  %v2096_v44 = vpop.f32.mrf.mxu0  ;;  %v2102_v32 = vadd.f32 %v3228_v30, %v4162_v34 }
 0x7d5   :  { %v3269_v17 = vpop.f32.mrf.mxu1 }
 0x7d6   :  { %v2264_v33 = vmul.f32 2.0, %v3269_v17  ;;  %3294 = vmatprep.mubr.bf16.mxu0 %v2287_v24  ;;  %v2277_v26 = vsub.f32 %v2261_v40, %v1712_v4  ;;  %v3232_v41 = vpop.f32.mrf.mxu0 }
 0x7d7   :  { %v2225_v11 = vpop.f32.mrf.mxu1  ;;  %3295 = vmatmul.mubr.bf16.gmra.mxu0 %v2288_v10  ;;  %v2105_v10 = vadd.f32 %v3229_v31, %v4166_v0 }
 0x7d8   :  { %v2262_v52 = vmul.f32 2.0, %v2225_v11  ;;  %v2280_v62 = vsub.f32 %v2264_v33, %v1715_v9  ;;  %v2109_v25 = vpop.f32.mrf.mxu0  ;;  %v2097_v33 = vadd.f32 %v2096_v44, %v4168_v29 }
 0x7d9   :  { %v3272_v14 = vpop.f32.mrf.mxu1 }
 0x7da   :  { %v2278_v16 = vsub.f32 %v2262_v52, %v1713_v47  ;;  %v2290_v12 = vpack.c.bf16 %v2280_v62, %v2279_v61  ;;  %v2267_v18 = vmul.f32 2.0, %v3272_v14  ;;  %v2118_v52 = vadd.f32 %v3232_v41, %v4170_v8 }
 0x7db   :  { %v2238_v55 = vpop.f32.mrf.mxu1  ;;  %v2110_v14 = vadd.f32 %v2109_v25, %v4172_v37 }
 0x7dc   :  { %v2289_v28 = vpack.c.bf16 %v2278_v16, %v2277_v26  ;;  %v2265_v27 = vmul.f32 2.0, %v2238_v55  ;;  %v2283_v5 = vsub.f32 %v2267_v18, %v1718_v43 }
 0x7dd   :  { %v3273_v51 = vpop.f32.mrf.mxu1 }
 0x7de   :  { %v2268_v23 = vmul.f32 2.0, %v3273_v51  ;;  %3298 = vmatprep.mubr.bf16.mxu1 %v2289_v28  ;;  %v2281_v15 = vsub.f32 %v2265_v27, %v1716_v42 }
 0x7df   :  { %v2241_v59 = vpop.f32.mrf.mxu1  ;;  %3299 = vmatmul.mubr.bf16.vlgmr.msra.gmra.mxu1 %v2290_v12 }
 0x7e0   :  { %v2266_v9 = vmul.f32 2.0, %v2241_v59  ;;  %v2284_v63 = vsub.f32 %v2268_v23, %v1719_v39  ;;  %v3233_v39 = vpop.f32.mrf.mxu0 }
 0x7e1   :  { %v2121_v0 = vadd.f32 %v3233_v39, %v4174_v49 }
 0x7e2   :  { %v2282_v57 = vsub.f32 %v2266_v9, %v1717_v60  ;;  %v2292_v4 = vpack.c.bf16 %v2284_v63, %v2283_v5  ;;  %v2112_v48 = vpop.f32.mrf.mxu0 }
 0x7e3   :  { %v2113_v29 = vadd.f32 %v2112_v48, %v4176_v22 }
 0x7e4   :  { %v2291_v47 = vpack.c.bf16 %v2282_v57, %v2281_v15  ;;  %v3236_v38 = vpop.f32.mrf.mxu0 }
 0x7e5   :  { %v2134_v8 = vadd.f32 %v3236_v38, %v4178_v1 }
 0x7e6   :  { %3302 = vmatprep.mubr.bf16.mxu1 %v2291_v47  ;;  %v2125_v42 = vpop.f32.mrf.mxu0 }
 0x7e7   :  { %3303 = vmatmul.mubr.bf16.gmra.mxu1 %v2292_v4  ;;  %v2126_v37 = vadd.f32 %v2125_v42, %v4180_v56 }
 0x7e8   :  { %v3237_v35 = vpop.f32.mrf.mxu0 }
 0x7e9   :  { %v2137_v49 = vadd.f32 %v3237_v35, %v4182_v45 }
 0x7ea   :  { %v2128_v46 = vpop.f32.mrf.mxu0 }
 0x7eb   :  { %v2129_v22 = vadd.f32 %v2128_v46, %v4184_v50 }
 0x7ec   :  { %v3240_v60 = vpop.f32.mrf.mxu0 }
 0x7ed   :  { %v2150_v1 = vadd.f32 %v3240_v60, %v4186_v21 }
 0x7ee   :  { %v2141_v53 = vpop.f32.mrf.mxu0 }
 0x7ef   :  { %v2142_v56 = vadd.f32 %v2141_v53, %v4188_v2 }
 0x7f0   :  { %v3241_v54 = vpop.f32.mrf.mxu0 }
 0x7f1   :  { %v2153_v45 = vadd.f32 %v3241_v54, %v4190_v13 }
 0x7f2   :  { %v2144_v43 = vpop.f32.mrf.mxu0 }
 0x7f3   :  { %v2145_v50 = vadd.f32 %v2144_v43, %v4192_v20 }
 0x88f   :  { %v3292_v36 = vpop.f32.mrf.mxu0 }
 0x890   :  { %v2457_v7 = vadd.f32 %v3292_v36, %v2102_v32 }
 0x891   :  { %v2392_v24 = vpop.f32.mrf.mxu0 }
 0x892   :  { %2473 = vst [vmem:[#allocation11 + $0x10] sm:$0xff] %v2457_v7  ;;  %v2455_v17 = vadd.f32 %v2392_v24, %v2094_v58 }
 0x893   :  { %v3293_v40 = vpop.f32.mrf.mxu0 }
 0x894   :  { %2471 = vst [vmem:[#allocation11] sm:$0xff] %v2455_v17  ;;  %v2458_v3 = vadd.f32 %v3293_v40, %v2105_v10 }
 0x895   :  { %v2395_v11 = vpop.f32.mrf.mxu0 }
 0x896   :  { %2474 = vst [vmem:[#allocation11 + $0x18] sm:$0xff] %v2458_v3  ;;  %v2456_v62 = vadd.f32 %v2395_v11, %v2097_v33 }
 0x897   :  { %v3296_v34 = vpop.f32.mrf.mxu0 }
 0x898   :  { %2472 = vst [vmem:[#allocation11 + $0x8] sm:$0xff] %v2456_v62  ;;  %v2461_v6 = vadd.f32 %v3296_v34, %v2118_v52 }
 0x899   :  { %v2408_v26 = vpop.f32.mrf.mxu0 }
 0x89a   :  { %2477 = vst [vmem:[#allocation11 + $0x30] sm:$0xff] %v2461_v6  ;;  %v2459_v16 = vadd.f32 %v2408_v26, %v2110_v14 }
 0x89b   :  { %v3297_v61 = vpop.f32.mrf.mxu0 }
 0x89c   :  { %2475 = vst [vmem:[#allocation11 + $0x20] sm:$0xff] %v2459_v16  ;;  %v2462_v55 = vadd.f32 %v3297_v61, %v2121_v0 }
 0x89d   :  { %v2411_v28 = vpop.f32.mrf.mxu0 }
 0x89e   :  { %2478 = vst [vmem:[#allocation11 + $0x38] sm:$0xff] %v2462_v55  ;;  %v2460_v12 = vadd.f32 %v2411_v28, %v2113_v29 }
 0x89f   :  { %v3300_v51 = vpop.f32.mrf.mxu1 }
 0x8a0   :  { %2476 = vst [vmem:[#allocation11 + $0x28] sm:$0xff] %v2460_v12  ;;  %v2465_v27 = vadd.f32 %v3300_v51, %v2134_v8 }
 0x8a1   :  { %v2424_v23 = vpop.f32.mrf.mxu1 }
 0x8a2   :  { %2481 = vst [vmem:[#allocation11 + $0x50] sm:$0xff] %v2465_v27  ;;  %v2463_v18 = vadd.f32 %v2424_v23, %v2126_v37 }
 0x8a3   :  { %v3301_v59 = vpop.f32.mrf.mxu1 }
 0x8a4   :  { %2479 = vst [vmem:[#allocation11 + $0x40] sm:$0xff] %v2463_v18  ;;  %v2466_v9 = vadd.f32 %v3301_v59, %v2137_v49 }
 0x8a5   :  { %v2427_v63 = vpop.f32.mrf.mxu1 }
 0x8a6   :  { %2482 = vst [vmem:[#allocation11 + $0x58] sm:$0xff] %v2466_v9  ;;  %v2464_v15 = vadd.f32 %v2427_v63, %v2129_v22 }
 0x8a7   :  { %v3304_v57 = vpop.f32.mrf.mxu1 }
 0x8a8   :  { %2480 = vst [vmem:[#allocation11 + $0x48] sm:$0xff] %v2464_v15  ;;  %v2469_v5 = vadd.f32 %v3304_v57, %v2150_v1 }
 0x8a9   :  { %v2440_v47 = vpop.f32.mrf.mxu1 }
 0x8aa   :  { %2485 = vst [vmem:[#allocation11 + $0x70] sm:$0xff] %v2469_v5  ;;  %v2467_v4 = vadd.f32 %v2440_v47, %v2142_v56 }
 0x8ab   :  { %v3305_v30 = vpop.f32.mrf.mxu1 }
 0x8ac   :  { %2483 = vst [vmem:[#allocation11 + $0x60] sm:$0xff] %v2467_v4  ;;  %v2470_v19 = vadd.f32 %v3305_v30, %v2153_v45 }
 0x8ad   :  { %v2443_v21 = vpop.f32.mrf.mxu1 }
 0x8ae   :  { %2486 = vst [vmem:[#allocation11 + $0x78] sm:$0xff] %v2470_v19  ;;  %v2468_v31 = vadd.f32 %v2443_v21, %v2145_v50 }
 0x8b0   :  { %2484 = vst [vmem:[#allocation11 + $0x68] sm:$0xff] %v2468_v31 }
 0x8b1   :  { %3531 = shalt.err (!%p3528_p1)
}
 0x8b2   :  { %2498 = dma.vmem_to_hbm [thread:$0]  %s2493_s4, 2048, %s4253_s5, [#allocation4], %s3549_s21, %s3549_s21, %s3550_s22  }
 0x8b3   :  { %3546 = dma.done.wait [#allocation4], 2048  }
 0x8b4   :  { %3547 = vsyncadd [#allocation4], 4294965248 }
 0x8b5   :  { %2502 = vsyncpa [#allocation3], 1 }
 0x8b6   :  { %2503 = vsyncpa [#allocation6], 1 }
 0x8b7   :  { %2504 = vsyncpa [#allocation9], 1 }
 0x8b8   :  { %2505 = vsyncpa [#allocation4], 1 }

</bundles_post_ra>
